<compile_context>
chip_gen: v6e
topology: v6e:2x2x1
jax: 0.10.0
libtpu: 0.0.40
codegen_flags: <defaults>
</compile_context>

<pallas_src>
import jax
import jax.numpy as jnp
import numpy as np
from jax.experimental import pallas as pl
from jax.experimental.pallas import tpu as pltpu


def _make_rcu_kernel(H, W, C):
    HW = H * W
    PAD = W + 1  # enough zeros each side for any 3x3 tap shift (|dy*W + dx| <= W + 1)

    def kernel(x_ref, w_ref, b_ref, o_ref):
        # x_ref: (1, C, HW)   current sample; channels on sublanes, H*W on lanes
        # w_ref: (2, 9, C, C) w[layer, tap, c_out, c_in], tap = (dy+1)*3 + (dx+1)
        # b_ref: (2, C, 1)
        # o_ref: (1, C, HW)
        x = x_ref[0]                                            # (C, HW) un-activated residual

        # Row-boundary masks for horizontal taps (dx != 0).  Vertical (dy) taps are
        # handled by the zero fill in `zp` below (in-kernel 'same' padding).
        lane = jax.lax.broadcasted_iota(jnp.int32, (C, HW), 1)
        wpos = lane % W
        mask_l = wpos >= 1            # valid positions when dx == -1
        mask_r = wpos <= (W - 2)      # valid positions when dx == +1

        zpad = jnp.zeros((C, PAD), dtype=jnp.float32)

        def conv3x3(z, layer):
            """3x3 'same' conv (+ bias) of z: (C, HW) using weights of `layer`."""
            zp = jnp.concatenate([zpad, z, zpad], axis=1)       # (C, HW + 2*PAD), zero-padded
            acc = jnp.broadcast_to(b_ref[layer], (C, HW))       # start from bias
            for dy in (-1, 0, 1):
                for dx in (-1, 0, 1):
                    s = dy * W + dx
                    # zero-filled shift: src[:, p] = z[:, p + s] if in range else 0
                    src = zp[:, PAD + s:PAD + s + HW]           # (C, HW)
                    if dx == -1:
                        src = jnp.where(mask_l, src, 0.0)
                    elif dx == 1:
                        src = jnp.where(mask_r, src, 0.0)
                    tap = (dy + 1) * 3 + (dx + 1)
                    wt = w_ref[layer, tap]                      # (C_out, C_in): one small load per tap
                    for ci in range(C):
                        col = wt[:, ci:ci + 1]                  # (C_out, 1) weight column (register slice)
                        row = src[ci:ci + 1, :]                 # (1, HW) input channel ci
                        acc = acc + col * row                   # lane-dense VPU broadcast-FMA
            return acc

        h = jnp.maximum(conv3x3(jnp.maximum(x, 0.0), 0), 0.0)   # relu(conv1(relu(x)) + b1)
        o_ref[0] = conv3x3(h, 1) + x                            # conv2(h) + b2 + x  (skip add)

    return kernel


def residual_conv_unit(x_nchw, w1, b1, w2, b2):
    """ResidualConvUnit forward (activation=ReLU, bn=False, groups=1).

    x_nchw: (N, C, H, W) float32
    w1, w2: (C, C, 3, 3) float32 (PyTorch OIHW)
    b1, b2: (C,) float32
    """
    N, C, H, W = x_nchw.shape
    HW = H * W
    x = x_nchw.reshape(N, C, HW).astype(jnp.float32)            # pure reshape, no transpose, no pad

    def prep_w(w):
        # (O, I, kh, kw) -> (kh, kw, O, I) -> (9, C_out, C_in)
        return jnp.transpose(w, (2, 3, 0, 1)).reshape(9, C, C)

    w_all = jnp.stack([prep_w(w1), prep_w(w2)], axis=0).astype(jnp.float32)    # (2, 9, C, C)
    b_all = jnp.stack([b1, b2], axis=0).reshape(2, C, 1).astype(jnp.float32)   # (2, C, 1)

    kernel = _make_rcu_kernel(H, W, C)

    out = pl.pallas_call(
        kernel,
        out_shape=jax.ShapeDtypeStruct((N, C, HW), jnp.float32),
        grid_spec=pltpu.PrefetchScalarGridSpec(
            num_scalar_prefetch=0,
            grid=(N,),
            in_specs=[
                pl.BlockSpec((1, C, HW), lambda n: (n, 0, 0)),      # x: one sample per step
                pl.BlockSpec((2, 9, C, C), lambda n: (0, 0, 0, 0)),  # weights: resident small tile
                pl.BlockSpec((2, C, 1), lambda n: (0, 0, 0)),        # biases
            ],
            out_specs=pl.BlockSpec((1, C, HW), lambda n: (n, 0, 0)),
        ),
        compiler_params=pltpu.CompilerParams(
            dimension_semantics=("parallel",),        # megacore split over N on v7x
            vmem_limit_bytes=32 * 1024 * 1024,        # safe on v5e/v6e (128 MiB) and v7x (64 MiB)
        ),
    )(x, w_all, b_all)

    return out.reshape(N, C, H, W)


def _reference(x, w1, b1, w2, b2):
    """Pure-JAX reference of the PyTorch forward (activation=ReLU, bn=False)."""
    def conv(z, w, b):
        y = jax.lax.conv_general_dilated(
            z, w, window_strides=(1, 1), padding=((1, 1), (1, 1)),
            dimension_numbers=("NCHW", "OIHW", "NCHW"),
            precision=jax.lax.Precision.HIGHEST)
        return y + b[None, :, None, None]
    out = jnp.maximum(x, 0.0)
    out = conv(out, w1, b1)
    out = jnp.maximum(out, 0.0)
    out = conv(out, w2, b2)
    return out + x


if __name__ == "__main__":
    N, C, H, W = 2, 4, 16, 16
    key = jax.random.PRNGKey(0)
    kx, k1, k2, k3, k4 = jax.random.split(key, 5)
    x = jax.random.normal(kx, (N, C, H, W), dtype=jnp.float32)
    w1 = 0.1 * jax.random.normal(k1, (C, C, 3, 3), dtype=jnp.float32)
    b1 = 0.1 * jax.random.normal(k2, (C,), dtype=jnp.float32)
    w2 = 0.1 * jax.random.normal(k3, (C, C, 3, 3), dtype=jnp.float32)
    b2 = 0.1 * jax.random.normal(k4, (C,), dtype=jnp.float32)

    out = jax.jit(residual_conv_unit)(x, w1, b1, w2, b2)
    out = jax.block_until_ready(out)

    ref = _reference(x, w1, b1, w2, b2)
    np.testing.assert_allclose(np.asarray(out), np.asarray(ref), rtol=1e-4, atol=1e-4)
    print("KERNEL_OK")
</pallas_src>

<mosaic_0001>
module attributes {stable_mosaic.version = 11 : i64} {
  func.func @kernel(%arg0: i32, %arg1: memref<1x4x256xf32, #tpu.memory_space<vmem>>, %arg2: memref<2x9x4x4xf32, #tpu.memory_space<vmem>>, %arg3: memref<2x4x1xf32, #tpu.memory_space<vmem>>, %arg4: memref<1x4x256xf32, #tpu.memory_space<vmem>>) attributes {dimension_semantics = [#tpu.dimension_semantics<parallel>], iteration_bounds = array<i64: 2>, scalar_prefetch = 0 : i64, scratch_operands = 0 : i64, tpu.core_type = #tpu.core_type<tc>, window_params = [{transform_indices = @transform_0, window_bounds = array<i64: 1, 4, 256>}, {pipeline_mode = #tpu.pipeline_mode<synchronous>, transform_indices = @transform_1, window_bounds = array<i64: 2, 9, 4, 4>}, {pipeline_mode = #tpu.pipeline_mode<synchronous>, transform_indices = @transform_2, window_bounds = array<i64: 2, 4, 1>}, {transform_indices = @transform_3, window_bounds = array<i64: 1, 4, 256>}]} {
    %c0 = arith.constant 0 : index
    %c0_0 = arith.constant 0 : index
    %c0_1 = arith.constant 0 : index
    %0 = vector.load %arg1[%c0, %c0_0, %c0_1] : memref<1x4x256xf32, #tpu.memory_space<vmem>>, vector<1x4x256xf32>
    %1 = vector.shape_cast %0 : vector<1x4x256xf32> to vector<4x256xf32>
    %2 = tpu.iota {dimensions = array<i32: 1>} : vector<4x256xi32>
    %c16_i32 = arith.constant 16 : i32
    %c0_i32 = arith.constant 0 : i32
    %3 = arith.cmpi eq, %c16_i32, %c0_i32 : i32
    %c1_i32 = arith.constant 1 : i32
    %4 = arith.select %3, %c1_i32, %c16_i32 : i32
    %5 = vector.broadcast %4 : i32 to vector<4x256xi32>
    %6 = arith.remsi %2, %5 : vector<4x256xi32>
    %c0_i32_2 = arith.constant 0 : i32
    %7 = vector.broadcast %c0_i32_2 : i32 to vector<4x256xi32>
    %8 = arith.cmpi ne, %6, %7 : vector<4x256xi32>
    %c0_i32_3 = arith.constant 0 : i32
    %9 = vector.broadcast %c0_i32_3 : i32 to vector<4x256xi32>
    %10 = arith.cmpi slt, %6, %9 : vector<4x256xi32>
    %c0_i32_4 = arith.constant 0 : i32
    %11 = arith.cmpi slt, %4, %c0_i32_4 : i32
    %12 = vector.broadcast %11 : i1 to vector<4x256xi1>
    %13 = vector.broadcast %12 : vector<4x256xi1> to vector<4x256xi1>
    %14 = arith.xori %10, %13 : vector<4x256xi1>
    %15 = arith.andi %14, %8 : vector<4x256xi1>
    %16 = vector.broadcast %4 : i32 to vector<4x256xi32>
    %17 = arith.addi %6, %16 : vector<4x256xi32>
    %18 = arith.select %15, %17, %6 : vector<4x256xi1>, vector<4x256xi32>
    %c1_i32_5 = arith.constant 1 : i32
    %19 = vector.broadcast %c1_i32_5 : i32 to vector<4x256xi32>
    %20 = arith.cmpi sge, %18, %19 : vector<4x256xi32>
    %c14_i32 = arith.constant 14 : i32
    %21 = vector.broadcast %c14_i32 : i32 to vector<4x256xi32>
    %22 = arith.cmpi sle, %18, %21 : vector<4x256xi32>
    %cst = arith.constant 0.000000e+00 : f32
    %23 = vector.broadcast %cst : f32 to vector<4x17xf32>
    %cst_6 = arith.constant 0.000000e+00 : f32
    %24 = vector.broadcast %cst_6 : f32 to vector<4x256xf32>
    %25 = arith.maximumf %1, %24 : vector<4x256xf32>
    %26 = tpu.concatenate %23, %25, %23 in 1 : vector<4x17xf32>, vector<4x256xf32>, vector<4x17xf32> -> vector<4x290xf32>
    %c0_7 = arith.constant 0 : index
    %c0_8 = arith.constant 0 : index
    %c0_9 = arith.constant 0 : index
    %27 = vector.load %arg3[%c0_7, %c0_8, %c0_9] : memref<2x4x1xf32, #tpu.memory_space<vmem>>, vector<1x4x1xf32>
    %28 = vector.shape_cast %27 : vector<1x4x1xf32> to vector<4x1xf32>
    %29 = vector.shape_cast %28 : vector<4x1xf32> to vector<4x1xf32>
    %30 = vector.broadcast %29 : vector<4x1xf32> to vector<4x256xf32>
    %31 = vector.extract_strided_slice %26 {offsets = [0, 0], sizes = [4, 256], strides = [1, 1]} : vector<4x290xf32> to vector<4x256xf32>
    %cst_10 = arith.constant 0.000000e+00 : f32
    %32 = vector.broadcast %cst_10 : f32 to vector<4x256xf32>
    %33 = arith.select %20, %31, %32 : vector<4x256xi1>, vector<4x256xf32>
    %c0_11 = arith.constant 0 : index
    %c0_12 = arith.constant 0 : index
    %c0_13 = arith.constant 0 : index
    %c0_14 = arith.constant 0 : index
    %34 = vector.load %arg2[%c0_11, %c0_12, %c0_13, %c0_14] : memref<2x9x4x4xf32, #tpu.memory_space<vmem>>, vector<1x1x4x4xf32>
    %35 = vector.shape_cast %34 : vector<1x1x4x4xf32> to vector<4x4xf32>
    %36 = vector.extract_strided_slice %35 {offsets = [0, 0], sizes = [4, 1], strides = [1, 1]} : vector<4x4xf32> to vector<4x1xf32>
    %37 = vector.extract_strided_slice %33 {offsets = [0, 0], sizes = [1, 256], strides = [1, 1]} : vector<4x256xf32> to vector<1x256xf32>
    %38 = vector.broadcast %36 : vector<4x1xf32> to vector<4x256xf32>
    %39 = vector.broadcast %37 : vector<1x256xf32> to vector<4x256xf32>
    %40 = arith.mulf %38, %39 : vector<4x256xf32>
    %41 = arith.addf %30, %40 : vector<4x256xf32>
    %42 = vector.extract_strided_slice %35 {offsets = [0, 1], sizes = [4, 1], strides = [1, 1]} : vector<4x4xf32> to vector<4x1xf32>
    %43 = vector.extract_strided_slice %33 {offsets = [1, 0], sizes = [1, 256], strides = [1, 1]} : vector<4x256xf32> to vector<1x256xf32>
    %44 = vector.broadcast %42 : vector<4x1xf32> to vector<4x256xf32>
    %45 = vector.broadcast %43 : vector<1x256xf32> to vector<4x256xf32>
    %46 = arith.mulf %44, %45 : vector<4x256xf32>
    %47 = arith.addf %41, %46 : vector<4x256xf32>
    %48 = vector.extract_strided_slice %35 {offsets = [0, 2], sizes = [4, 1], strides = [1, 1]} : vector<4x4xf32> to vector<4x1xf32>
    %49 = vector.extract_strided_slice %33 {offsets = [2, 0], sizes = [1, 256], strides = [1, 1]} : vector<4x256xf32> to vector<1x256xf32>
    %50 = vector.broadcast %48 : vector<4x1xf32> to vector<4x256xf32>
    %51 = vector.broadcast %49 : vector<1x256xf32> to vector<4x256xf32>
    %52 = arith.mulf %50, %51 : vector<4x256xf32>
    %53 = arith.addf %47, %52 : vector<4x256xf32>
    %54 = vector.extract_strided_slice %35 {offsets = [0, 3], sizes = [4, 1], strides = [1, 1]} : vector<4x4xf32> to vector<4x1xf32>
    %55 = vector.extract_strided_slice %33 {offsets = [3, 0], sizes = [1, 256], strides = [1, 1]} : vector<4x256xf32> to vector<1x256xf32>
    %56 = vector.broadcast %54 : vector<4x1xf32> to vector<4x256xf32>
    %57 = vector.broadcast %55 : vector<1x256xf32> to vector<4x256xf32>
    %58 = arith.mulf %56, %57 : vector<4x256xf32>
    %59 = arith.addf %53, %58 : vector<4x256xf32>
    %60 = vector.extract_strided_slice %26 {offsets = [0, 1], sizes = [4, 256], strides = [1, 1]} : vector<4x290xf32> to vector<4x256xf32>
    %c0_15 = arith.constant 0 : index
    %c1 = arith.constant 1 : index
    %c0_16 = arith.constant 0 : index
    %c0_17 = arith.constant 0 : index
    %61 = vector.load %arg2[%c0_15, %c1, %c0_16, %c0_17] : memref<2x9x4x4xf32, #tpu.memory_space<vmem>>, vector<1x1x4x4xf32>
    %62 = vector.shape_cast %61 : vector<1x1x4x4xf32> to vector<4x4xf32>
    %63 = vector.extract_strided_slice %62 {offsets = [0, 0], sizes = [4, 1], strides = [1, 1]} : vector<4x4xf32> to vector<4x1xf32>
    %64 = vector.extract_strided_slice %60 {offsets = [0, 0], sizes = [1, 256], strides = [1, 1]} : vector<4x256xf32> to vector<1x256xf32>
    %65 = vector.broadcast %63 : vector<4x1xf32> to vector<4x256xf32>
    %66 = vector.broadcast %64 : vector<1x256xf32> to vector<4x256xf32>
    %67 = arith.mulf %65, %66 : vector<4x256xf32>
    %68 = arith.addf %59, %67 : vector<4x256xf32>
    %69 = vector.extract_strided_slice %62 {offsets = [0, 1], sizes = [4, 1], strides = [1, 1]} : vector<4x4xf32> to vector<4x1xf32>
    %70 = vector.extract_strided_slice %60 {offsets = [1, 0], sizes = [1, 256], strides = [1, 1]} : vector<4x256xf32> to vector<1x256xf32>
    %71 = vector.broadcast %69 : vector<4x1xf32> to vector<4x256xf32>
    %72 = vector.broadcast %70 : vector<1x256xf32> to vector<4x256xf32>
    %73 = arith.mulf %71, %72 : vector<4x256xf32>
    %74 = arith.addf %68, %73 : vector<4x256xf32>
    %75 = vector.extract_strided_slice %62 {offsets = [0, 2], sizes = [4, 1], strides = [1, 1]} : vector<4x4xf32> to vector<4x1xf32>
    %76 = vector.extract_strided_slice %60 {offsets = [2, 0], sizes = [1, 256], strides = [1, 1]} : vector<4x256xf32> to vector<1x256xf32>
    %77 = vector.broadcast %75 : vector<4x1xf32> to vector<4x256xf32>
    %78 = vector.broadcast %76 : vector<1x256xf32> to vector<4x256xf32>
    %79 = arith.mulf %77, %78 : vector<4x256xf32>
    %80 = arith.addf %74, %79 : vector<4x256xf32>
    %81 = vector.extract_strided_slice %62 {offsets = [0, 3], sizes = [4, 1], strides = [1, 1]} : vector<4x4xf32> to vector<4x1xf32>
    %82 = vector.extract_strided_slice %60 {offsets = [3, 0], sizes = [1, 256], strides = [1, 1]} : vector<4x256xf32> to vector<1x256xf32>
    %83 = vector.broadcast %81 : vector<4x1xf32> to vector<4x256xf32>
    %84 = vector.broadcast %82 : vector<1x256xf32> to vector<4x256xf32>
    %85 = arith.mulf %83, %84 : vector<4x256xf32>
    %86 = arith.addf %80, %85 : vector<4x256xf32>
    %87 = vector.extract_strided_slice %26 {offsets = [0, 2], sizes = [4, 256], strides = [1, 1]} : vector<4x290xf32> to vector<4x256xf32>
    %cst_18 = arith.constant 0.000000e+00 : f32
    %88 = vector.broadcast %cst_18 : f32 to vector<4x256xf32>
    %89 = arith.select %22, %87, %88 : vector<4x256xi1>, vector<4x256xf32>
    %c0_19 = arith.constant 0 : index
    %c2 = arith.constant 2 : index
    %c0_20 = arith.constant 0 : index
    %c0_21 = arith.constant 0 : index
    %90 = vector.load %arg2[%c0_19, %c2, %c0_20, %c0_21] : memref<2x9x4x4xf32, #tpu.memory_space<vmem>>, vector<1x1x4x4xf32>
    %91 = vector.shape_cast %90 : vector<1x1x4x4xf32> to vector<4x4xf32>
    %92 = vector.extract_strided_slice %91 {offsets = [0, 0], sizes = [4, 1], strides = [1, 1]} : vector<4x4xf32> to vector<4x1xf32>
    %93 = vector.extract_strided_slice %89 {offsets = [0, 0], sizes = [1, 256], strides = [1, 1]} : vector<4x256xf32> to vector<1x256xf32>
    %94 = vector.broadcast %92 : vector<4x1xf32> to vector<4x256xf32>
    %95 = vector.broadcast %93 : vector<1x256xf32> to vector<4x256xf32>
    %96 = arith.mulf %94, %95 : vector<4x256xf32>
    %97 = arith.addf %86, %96 : vector<4x256xf32>
    %98 = vector.extract_strided_slice %91 {offsets = [0, 1], sizes = [4, 1], strides = [1, 1]} : vector<4x4xf32> to vector<4x1xf32>
    %99 = vector.extract_strided_slice %89 {offsets = [1, 0], sizes = [1, 256], strides = [1, 1]} : vector<4x256xf32> to vector<1x256xf32>
    %100 = vector.broadcast %98 : vector<4x1xf32> to vector<4x256xf32>
    %101 = vector.broadcast %99 : vector<1x256xf32> to vector<4x256xf32>
    %102 = arith.mulf %100, %101 : vector<4x256xf32>
    %103 = arith.addf %97, %102 : vector<4x256xf32>
    %104 = vector.extract_strided_slice %91 {offsets = [0, 2], sizes = [4, 1], strides = [1, 1]} : vector<4x4xf32> to vector<4x1xf32>
    %105 = vector.extract_strided_slice %89 {offsets = [2, 0], sizes = [1, 256], strides = [1, 1]} : vector<4x256xf32> to vector<1x256xf32>
    %106 = vector.broadcast %104 : vector<4x1xf32> to vector<4x256xf32>
    %107 = vector.broadcast %105 : vector<1x256xf32> to vector<4x256xf32>
    %108 = arith.mulf %106, %107 : vector<4x256xf32>
    %109 = arith.addf %103, %108 : vector<4x256xf32>
    %110 = vector.extract_strided_slice %91 {offsets = [0, 3], sizes = [4, 1], strides = [1, 1]} : vector<4x4xf32> to vector<4x1xf32>
    %111 = vector.extract_strided_slice %89 {offsets = [3, 0], sizes = [1, 256], strides = [1, 1]} : vector<4x256xf32> to vector<1x256xf32>
    %112 = vector.broadcast %110 : vector<4x1xf32> to vector<4x256xf32>
    %113 = vector.broadcast %111 : vector<1x256xf32> to vector<4x256xf32>
    %114 = arith.mulf %112, %113 : vector<4x256xf32>
    %115 = arith.addf %109, %114 : vector<4x256xf32>
    %116 = vector.extract_strided_slice %26 {offsets = [0, 16], sizes = [4, 256], strides = [1, 1]} : vector<4x290xf32> to vector<4x256xf32>
    %cst_22 = arith.constant 0.000000e+00 : f32
    %117 = vector.broadcast %cst_22 : f32 to vector<4x256xf32>
    %118 = arith.select %20, %116, %117 : vector<4x256xi1>, vector<4x256xf32>
    %c0_23 = arith.constant 0 : index
    %c3 = arith.constant 3 : index
    %c0_24 = arith.constant 0 : index
    %c0_25 = arith.constant 0 : index
    %119 = vector.load %arg2[%c0_23, %c3, %c0_24, %c0_25] : memref<2x9x4x4xf32, #tpu.memory_space<vmem>>, vector<1x1x4x4xf32>
    %120 = vector.shape_cast %119 : vector<1x1x4x4xf32> to vector<4x4xf32>
    %121 = vector.extract_strided_slice %120 {offsets = [0, 0], sizes = [4, 1], strides = [1, 1]} : vector<4x4xf32> to vector<4x1xf32>
    %122 = vector.extract_strided_slice %118 {offsets = [0, 0], sizes = [1, 256], strides = [1, 1]} : vector<4x256xf32> to vector<1x256xf32>
    %123 = vector.broadcast %121 : vector<4x1xf32> to vector<4x256xf32>
    %124 = vector.broadcast %122 : vector<1x256xf32> to vector<4x256xf32>
    %125 = arith.mulf %123, %124 : vector<4x256xf32>
    %126 = arith.addf %115, %125 : vector<4x256xf32>
    %127 = vector.extract_strided_slice %120 {offsets = [0, 1], sizes = [4, 1], strides = [1, 1]} : vector<4x4xf32> to vector<4x1xf32>
    %128 = vector.extract_strided_slice %118 {offsets = [1, 0], sizes = [1, 256], strides = [1, 1]} : vector<4x256xf32> to vector<1x256xf32>
    %129 = vector.broadcast %127 : vector<4x1xf32> to vector<4x256xf32>
    %130 = vector.broadcast %128 : vector<1x256xf32> to vector<4x256xf32>
    %131 = arith.mulf %129, %130 : vector<4x256xf32>
    %132 = arith.addf %126, %131 : vector<4x256xf32>
    %133 = vector.extract_strided_slice %120 {offsets = [0, 2], sizes = [4, 1], strides = [1, 1]} : vector<4x4xf32> to vector<4x1xf32>
    %134 = vector.extract_strided_slice %118 {offsets = [2, 0], sizes = [1, 256], strides = [1, 1]} : vector<4x256xf32> to vector<1x256xf32>
    %135 = vector.broadcast %133 : vector<4x1xf32> to vector<4x256xf32>
    %136 = vector.broadcast %134 : vector<1x256xf32> to vector<4x256xf32>
    %137 = arith.mulf %135, %136 : vector<4x256xf32>
    %138 = arith.addf %132, %137 : vector<4x256xf32>
    %139 = vector.extract_strided_slice %120 {offsets = [0, 3], sizes = [4, 1], strides = [1, 1]} : vector<4x4xf32> to vector<4x1xf32>
    %140 = vector.extract_strided_slice %118 {offsets = [3, 0], sizes = [1, 256], strides = [1, 1]} : vector<4x256xf32> to vector<1x256xf32>
    %141 = vector.broadcast %139 : vector<4x1xf32> to vector<4x256xf32>
    %142 = vector.broadcast %140 : vector<1x256xf32> to vector<4x256xf32>
    %143 = arith.mulf %141, %142 : vector<4x256xf32>
    %144 = arith.addf %138, %143 : vector<4x256xf32>
    %145 = vector.extract_strided_slice %26 {offsets = [0, 17], sizes = [4, 256], strides = [1, 1]} : vector<4x290xf32> to vector<4x256xf32>
    %c0_26 = arith.constant 0 : index
    %c4 = arith.constant 4 : index
    %c0_27 = arith.constant 0 : index
    %c0_28 = arith.constant 0 : index
    %146 = vector.load %arg2[%c0_26, %c4, %c0_27, %c0_28] : memref<2x9x4x4xf32, #tpu.memory_space<vmem>>, vector<1x1x4x4xf32>
    %147 = vector.shape_cast %146 : vector<1x1x4x4xf32> to vector<4x4xf32>
    %148 = vector.extract_strided_slice %147 {offsets = [0, 0], sizes = [4, 1], strides = [1, 1]} : vector<4x4xf32> to vector<4x1xf32>
    %149 = vector.extract_strided_slice %145 {offsets = [0, 0], sizes = [1, 256], strides = [1, 1]} : vector<4x256xf32> to vector<1x256xf32>
    %150 = vector.broadcast %148 : vector<4x1xf32> to vector<4x256xf32>
    %151 = vector.broadcast %149 : vector<1x256xf32> to vector<4x256xf32>
    %152 = arith.mulf %150, %151 : vector<4x256xf32>
    %153 = arith.addf %144, %152 : vector<4x256xf32>
    %154 = vector.extract_strided_slice %147 {offsets = [0, 1], sizes = [4, 1], strides = [1, 1]} : vector<4x4xf32> to vector<4x1xf32>
    %155 = vector.extract_strided_slice %145 {offsets = [1, 0], sizes = [1, 256], strides = [1, 1]} : vector<4x256xf32> to vector<1x256xf32>
    %156 = vector.broadcast %154 : vector<4x1xf32> to vector<4x256xf32>
    %157 = vector.broadcast %155 : vector<1x256xf32> to vector<4x256xf32>
    %158 = arith.mulf %156, %157 : vector<4x256xf32>
    %159 = arith.addf %153, %158 : vector<4x256xf32>
    %160 = vector.extract_strided_slice %147 {offsets = [0, 2], sizes = [4, 1], strides = [1, 1]} : vector<4x4xf32> to vector<4x1xf32>
    %161 = vector.extract_strided_slice %145 {offsets = [2, 0], sizes = [1, 256], strides = [1, 1]} : vector<4x256xf32> to vector<1x256xf32>
    %162 = vector.broadcast %160 : vector<4x1xf32> to vector<4x256xf32>
    %163 = vector.broadcast %161 : vector<1x256xf32> to vector<4x256xf32>
    %164 = arith.mulf %162, %163 : vector<4x256xf32>
    %165 = arith.addf %159, %164 : vector<4x256xf32>
    %166 = vector.extract_strided_slice %147 {offsets = [0, 3], sizes = [4, 1], strides = [1, 1]} : vector<4x4xf32> to vector<4x1xf32>
    %167 = vector.extract_strided_slice %145 {offsets = [3, 0], sizes = [1, 256], strides = [1, 1]} : vector<4x256xf32> to vector<1x256xf32>
    %168 = vector.broadcast %166 : vector<4x1xf32> to vector<4x256xf32>
    %169 = vector.broadcast %167 : vector<1x256xf32> to vector<4x256xf32>
    %170 = arith.mulf %168, %169 : vector<4x256xf32>
    %171 = arith.addf %165, %170 : vector<4x256xf32>
    %172 = vector.extract_strided_slice %26 {offsets = [0, 18], sizes = [4, 256], strides = [1, 1]} : vector<4x290xf32> to vector<4x256xf32>
    %cst_29 = arith.constant 0.000000e+00 : f32
    %173 = vector.broadcast %cst_29 : f32 to vector<4x256xf32>
    %174 = arith.select %22, %172, %173 : vector<4x256xi1>, vector<4x256xf32>
    %c0_30 = arith.constant 0 : index
    %c5 = arith.constant 5 : index
    %c0_31 = arith.constant 0 : index
    %c0_32 = arith.constant 0 : index
    %175 = vector.load %arg2[%c0_30, %c5, %c0_31, %c0_32] : memref<2x9x4x4xf32, #tpu.memory_space<vmem>>, vector<1x1x4x4xf32>
    %176 = vector.shape_cast %175 : vector<1x1x4x4xf32> to vector<4x4xf32>
    %177 = vector.extract_strided_slice %176 {offsets = [0, 0], sizes = [4, 1], strides = [1, 1]} : vector<4x4xf32> to vector<4x1xf32>
    %178 = vector.extract_strided_slice %174 {offsets = [0, 0], sizes = [1, 256], strides = [1, 1]} : vector<4x256xf32> to vector<1x256xf32>
    %179 = vector.broadcast %177 : vector<4x1xf32> to vector<4x256xf32>
    %180 = vector.broadcast %178 : vector<1x256xf32> to vector<4x256xf32>
    %181 = arith.mulf %179, %180 : vector<4x256xf32>
    %182 = arith.addf %171, %181 : vector<4x256xf32>
    %183 = vector.extract_strided_slice %176 {offsets = [0, 1], sizes = [4, 1], strides = [1, 1]} : vector<4x4xf32> to vector<4x1xf32>
    %184 = vector.extract_strided_slice %174 {offsets = [1, 0], sizes = [1, 256], strides = [1, 1]} : vector<4x256xf32> to vector<1x256xf32>
    %185 = vector.broadcast %183 : vector<4x1xf32> to vector<4x256xf32>
    %186 = vector.broadcast %184 : vector<1x256xf32> to vector<4x256xf32>
    %187 = arith.mulf %185, %186 : vector<4x256xf32>
    %188 = arith.addf %182, %187 : vector<4x256xf32>
    %189 = vector.extract_strided_slice %176 {offsets = [0, 2], sizes = [4, 1], strides = [1, 1]} : vector<4x4xf32> to vector<4x1xf32>
    %190 = vector.extract_strided_slice %174 {offsets = [2, 0], sizes = [1, 256], strides = [1, 1]} : vector<4x256xf32> to vector<1x256xf32>
    %191 = vector.broadcast %189 : vector<4x1xf32> to vector<4x256xf32>
    %192 = vector.broadcast %190 : vector<1x256xf32> to vector<4x256xf32>
    %193 = arith.mulf %191, %192 : vector<4x256xf32>
    %194 = arith.addf %188, %193 : vector<4x256xf32>
    %195 = vector.extract_strided_slice %176 {offsets = [0, 3], sizes = [4, 1], strides = [1, 1]} : vector<4x4xf32> to vector<4x1xf32>
    %196 = vector.extract_strided_slice %174 {offsets = [3, 0], sizes = [1, 256], strides = [1, 1]} : vector<4x256xf32> to vector<1x256xf32>
    %197 = vector.broadcast %195 : vector<4x1xf32> to vector<4x256xf32>
    %198 = vector.broadcast %196 : vector<1x256xf32> to vector<4x256xf32>
    %199 = arith.mulf %197, %198 : vector<4x256xf32>
    %200 = arith.addf %194, %199 : vector<4x256xf32>
    %201 = vector.extract_strided_slice %26 {offsets = [0, 32], sizes = [4, 256], strides = [1, 1]} : vector<4x290xf32> to vector<4x256xf32>
    %cst_33 = arith.constant 0.000000e+00 : f32
    %202 = vector.broadcast %cst_33 : f32 to vector<4x256xf32>
    %203 = arith.select %20, %201, %202 : vector<4x256xi1>, vector<4x256xf32>
    %c0_34 = arith.constant 0 : index
    %c6 = arith.constant 6 : index
    %c0_35 = arith.constant 0 : index
    %c0_36 = arith.constant 0 : index
    %204 = vector.load %arg2[%c0_34, %c6, %c0_35, %c0_36] : memref<2x9x4x4xf32, #tpu.memory_space<vmem>>, vector<1x1x4x4xf32>
    %205 = vector.shape_cast %204 : vector<1x1x4x4xf32> to vector<4x4xf32>
    %206 = vector.extract_strided_slice %205 {offsets = [0, 0], sizes = [4, 1], strides = [1, 1]} : vector<4x4xf32> to vector<4x1xf32>
    %207 = vector.extract_strided_slice %203 {offsets = [0, 0], sizes = [1, 256], strides = [1, 1]} : vector<4x256xf32> to vector<1x256xf32>
    %208 = vector.broadcast %206 : vector<4x1xf32> to vector<4x256xf32>
    %209 = vector.broadcast %207 : vector<1x256xf32> to vector<4x256xf32>
    %210 = arith.mulf %208, %209 : vector<4x256xf32>
    %211 = arith.addf %200, %210 : vector<4x256xf32>
    %212 = vector.extract_strided_slice %205 {offsets = [0, 1], sizes = [4, 1], strides = [1, 1]} : vector<4x4xf32> to vector<4x1xf32>
    %213 = vector.extract_strided_slice %203 {offsets = [1, 0], sizes = [1, 256], strides = [1, 1]} : vector<4x256xf32> to vector<1x256xf32>
    %214 = vector.broadcast %212 : vector<4x1xf32> to vector<4x256xf32>
    %215 = vector.broadcast %213 : vector<1x256xf32> to vector<4x256xf32>
    %216 = arith.mulf %214, %215 : vector<4x256xf32>
    %217 = arith.addf %211, %216 : vector<4x256xf32>
    %218 = vector.extract_strided_slice %205 {offsets = [0, 2], sizes = [4, 1], strides = [1, 1]} : vector<4x4xf32> to vector<4x1xf32>
    %219 = vector.extract_strided_slice %203 {offsets = [2, 0], sizes = [1, 256], strides = [1, 1]} : vector<4x256xf32> to vector<1x256xf32>
    %220 = vector.broadcast %218 : vector<4x1xf32> to vector<4x256xf32>
    %221 = vector.broadcast %219 : vector<1x256xf32> to vector<4x256xf32>
    %222 = arith.mulf %220, %221 : vector<4x256xf32>
    %223 = arith.addf %217, %222 : vector<4x256xf32>
    %224 = vector.extract_strided_slice %205 {offsets = [0, 3], sizes = [4, 1], strides = [1, 1]} : vector<4x4xf32> to vector<4x1xf32>
    %225 = vector.extract_strided_slice %203 {offsets = [3, 0], sizes = [1, 256], strides = [1, 1]} : vector<4x256xf32> to vector<1x256xf32>
    %226 = vector.broadcast %224 : vector<4x1xf32> to vector<4x256xf32>
    %227 = vector.broadcast %225 : vector<1x256xf32> to vector<4x256xf32>
    %228 = arith.mulf %226, %227 : vector<4x256xf32>
    %229 = arith.addf %223, %228 : vector<4x256xf32>
    %230 = vector.extract_strided_slice %26 {offsets = [0, 33], sizes = [4, 256], strides = [1, 1]} : vector<4x290xf32> to vector<4x256xf32>
    %c0_37 = arith.constant 0 : index
    %c7 = arith.constant 7 : index
    %c0_38 = arith.constant 0 : index
    %c0_39 = arith.constant 0 : index
    %231 = vector.load %arg2[%c0_37, %c7, %c0_38, %c0_39] : memref<2x9x4x4xf32, #tpu.memory_space<vmem>>, vector<1x1x4x4xf32>
    %232 = vector.shape_cast %231 : vector<1x1x4x4xf32> to vector<4x4xf32>
    %233 = vector.extract_strided_slice %232 {offsets = [0, 0], sizes = [4, 1], strides = [1, 1]} : vector<4x4xf32> to vector<4x1xf32>
    %234 = vector.extract_strided_slice %230 {offsets = [0, 0], sizes = [1, 256], strides = [1, 1]} : vector<4x256xf32> to vector<1x256xf32>
    %235 = vector.broadcast %233 : vector<4x1xf32> to vector<4x256xf32>
    %236 = vector.broadcast %234 : vector<1x256xf32> to vector<4x256xf32>
    %237 = arith.mulf %235, %236 : vector<4x256xf32>
    %238 = arith.addf %229, %237 : vector<4x256xf32>
    %239 = vector.extract_strided_slice %232 {offsets = [0, 1], sizes = [4, 1], strides = [1, 1]} : vector<4x4xf32> to vector<4x1xf32>
    %240 = vector.extract_strided_slice %230 {offsets = [1, 0], sizes = [1, 256], strides = [1, 1]} : vector<4x256xf32> to vector<1x256xf32>
    %241 = vector.broadcast %239 : vector<4x1xf32> to vector<4x256xf32>
    %242 = vector.broadcast %240 : vector<1x256xf32> to vector<4x256xf32>
    %243 = arith.mulf %241, %242 : vector<4x256xf32>
    %244 = arith.addf %238, %243 : vector<4x256xf32>
    %245 = vector.extract_strided_slice %232 {offsets = [0, 2], sizes = [4, 1], strides = [1, 1]} : vector<4x4xf32> to vector<4x1xf32>
    %246 = vector.extract_strided_slice %230 {offsets = [2, 0], sizes = [1, 256], strides = [1, 1]} : vector<4x256xf32> to vector<1x256xf32>
    %247 = vector.broadcast %245 : vector<4x1xf32> to vector<4x256xf32>
    %248 = vector.broadcast %246 : vector<1x256xf32> to vector<4x256xf32>
    %249 = arith.mulf %247, %248 : vector<4x256xf32>
    %250 = arith.addf %244, %249 : vector<4x256xf32>
    %251 = vector.extract_strided_slice %232 {offsets = [0, 3], sizes = [4, 1], strides = [1, 1]} : vector<4x4xf32> to vector<4x1xf32>
    %252 = vector.extract_strided_slice %230 {offsets = [3, 0], sizes = [1, 256], strides = [1, 1]} : vector<4x256xf32> to vector<1x256xf32>
    %253 = vector.broadcast %251 : vector<4x1xf32> to vector<4x256xf32>
    %254 = vector.broadcast %252 : vector<1x256xf32> to vector<4x256xf32>
    %255 = arith.mulf %253, %254 : vector<4x256xf32>
    %256 = arith.addf %250, %255 : vector<4x256xf32>
    %257 = vector.extract_strided_slice %26 {offsets = [0, 34], sizes = [4, 256], strides = [1, 1]} : vector<4x290xf32> to vector<4x256xf32>
    %cst_40 = arith.constant 0.000000e+00 : f32
    %258 = vector.broadcast %cst_40 : f32 to vector<4x256xf32>
    %259 = arith.select %22, %257, %258 : vector<4x256xi1>, vector<4x256xf32>
    %c0_41 = arith.constant 0 : index
    %c8 = arith.constant 8 : index
    %c0_42 = arith.constant 0 : index
    %c0_43 = arith.constant 0 : index
    %260 = vector.load %arg2[%c0_41, %c8, %c0_42, %c0_43] : memref<2x9x4x4xf32, #tpu.memory_space<vmem>>, vector<1x1x4x4xf32>
    %261 = vector.shape_cast %260 : vector<1x1x4x4xf32> to vector<4x4xf32>
    %262 = vector.extract_strided_slice %261 {offsets = [0, 0], sizes = [4, 1], strides = [1, 1]} : vector<4x4xf32> to vector<4x1xf32>
    %263 = vector.extract_strided_slice %259 {offsets = [0, 0], sizes = [1, 256], strides = [1, 1]} : vector<4x256xf32> to vector<1x256xf32>
    %264 = vector.broadcast %262 : vector<4x1xf32> to vector<4x256xf32>
    %265 = vector.broadcast %263 : vector<1x256xf32> to vector<4x256xf32>
    %266 = arith.mulf %264, %265 : vector<4x256xf32>
    %267 = arith.addf %256, %266 : vector<4x256xf32>
    %268 = vector.extract_strided_slice %261 {offsets = [0, 1], sizes = [4, 1], strides = [1, 1]} : vector<4x4xf32> to vector<4x1xf32>
    %269 = vector.extract_strided_slice %259 {offsets = [1, 0], sizes = [1, 256], strides = [1, 1]} : vector<4x256xf32> to vector<1x256xf32>
    %270 = vector.broadcast %268 : vector<4x1xf32> to vector<4x256xf32>
    %271 = vector.broadcast %269 : vector<1x256xf32> to vector<4x256xf32>
    %272 = arith.mulf %270, %271 : vector<4x256xf32>
    %273 = arith.addf %267, %272 : vector<4x256xf32>
    %274 = vector.extract_strided_slice %261 {offsets = [0, 2], sizes = [4, 1], strides = [1, 1]} : vector<4x4xf32> to vector<4x1xf32>
    %275 = vector.extract_strided_slice %259 {offsets = [2, 0], sizes = [1, 256], strides = [1, 1]} : vector<4x256xf32> to vector<1x256xf32>
    %276 = vector.broadcast %274 : vector<4x1xf32> to vector<4x256xf32>
    %277 = vector.broadcast %275 : vector<1x256xf32> to vector<4x256xf32>
    %278 = arith.mulf %276, %277 : vector<4x256xf32>
    %279 = arith.addf %273, %278 : vector<4x256xf32>
    %280 = vector.extract_strided_slice %261 {offsets = [0, 3], sizes = [4, 1], strides = [1, 1]} : vector<4x4xf32> to vector<4x1xf32>
    %281 = vector.extract_strided_slice %259 {offsets = [3, 0], sizes = [1, 256], strides = [1, 1]} : vector<4x256xf32> to vector<1x256xf32>
    %282 = vector.broadcast %280 : vector<4x1xf32> to vector<4x256xf32>
    %283 = vector.broadcast %281 : vector<1x256xf32> to vector<4x256xf32>
    %284 = arith.mulf %282, %283 : vector<4x256xf32>
    %285 = arith.addf %279, %284 : vector<4x256xf32>
    %cst_44 = arith.constant 0.000000e+00 : f32
    %286 = vector.broadcast %cst_44 : f32 to vector<4x256xf32>
    %287 = arith.maximumf %285, %286 : vector<4x256xf32>
    %288 = tpu.concatenate %23, %287, %23 in 1 : vector<4x17xf32>, vector<4x256xf32>, vector<4x17xf32> -> vector<4x290xf32>
    %c1_45 = arith.constant 1 : index
    %c0_46 = arith.constant 0 : index
    %c0_47 = arith.constant 0 : index
    %289 = vector.load %arg3[%c1_45, %c0_46, %c0_47] : memref<2x4x1xf32, #tpu.memory_space<vmem>>, vector<1x4x1xf32>
    %290 = vector.shape_cast %289 : vector<1x4x1xf32> to vector<4x1xf32>
    %291 = vector.shape_cast %290 : vector<4x1xf32> to vector<4x1xf32>
    %292 = vector.broadcast %291 : vector<4x1xf32> to vector<4x256xf32>
    %293 = vector.extract_strided_slice %288 {offsets = [0, 0], sizes = [4, 256], strides = [1, 1]} : vector<4x290xf32> to vector<4x256xf32>
    %cst_48 = arith.constant 0.000000e+00 : f32
    %294 = vector.broadcast %cst_48 : f32 to vector<4x256xf32>
    %295 = arith.select %20, %293, %294 : vector<4x256xi1>, vector<4x256xf32>
    %c1_49 = arith.constant 1 : index
    %c0_50 = arith.constant 0 : index
    %c0_51 = arith.constant 0 : index
    %c0_52 = arith.constant 0 : index
    %296 = vector.load %arg2[%c1_49, %c0_50, %c0_51, %c0_52] : memref<2x9x4x4xf32, #tpu.memory_space<vmem>>, vector<1x1x4x4xf32>
    %297 = vector.shape_cast %296 : vector<1x1x4x4xf32> to vector<4x4xf32>
    %298 = vector.extract_strided_slice %297 {offsets = [0, 0], sizes = [4, 1], strides = [1, 1]} : vector<4x4xf32> to vector<4x1xf32>
    %299 = vector.extract_strided_slice %295 {offsets = [0, 0], sizes = [1, 256], strides = [1, 1]} : vector<4x256xf32> to vector<1x256xf32>
    %300 = vector.broadcast %298 : vector<4x1xf32> to vector<4x256xf32>
    %301 = vector.broadcast %299 : vector<1x256xf32> to vector<4x256xf32>
    %302 = arith.mulf %300, %301 : vector<4x256xf32>
    %303 = arith.addf %292, %302 : vector<4x256xf32>
    %304 = vector.extract_strided_slice %297 {offsets = [0, 1], sizes = [4, 1], strides = [1, 1]} : vector<4x4xf32> to vector<4x1xf32>
    %305 = vector.extract_strided_slice %295 {offsets = [1, 0], sizes = [1, 256], strides = [1, 1]} : vector<4x256xf32> to vector<1x256xf32>
    %306 = vector.broadcast %304 : vector<4x1xf32> to vector<4x256xf32>
    %307 = vector.broadcast %305 : vector<1x256xf32> to vector<4x256xf32>
    %308 = arith.mulf %306, %307 : vector<4x256xf32>
    %309 = arith.addf %303, %308 : vector<4x256xf32>
    %310 = vector.extract_strided_slice %297 {offsets = [0, 2], sizes = [4, 1], strides = [1, 1]} : vector<4x4xf32> to vector<4x1xf32>
    %311 = vector.extract_strided_slice %295 {offsets = [2, 0], sizes = [1, 256], strides = [1, 1]} : vector<4x256xf32> to vector<1x256xf32>
    %312 = vector.broadcast %310 : vector<4x1xf32> to vector<4x256xf32>
    %313 = vector.broadcast %311 : vector<1x256xf32> to vector<4x256xf32>
    %314 = arith.mulf %312, %313 : vector<4x256xf32>
    %315 = arith.addf %309, %314 : vector<4x256xf32>
    %316 = vector.extract_strided_slice %297 {offsets = [0, 3], sizes = [4, 1], strides = [1, 1]} : vector<4x4xf32> to vector<4x1xf32>
    %317 = vector.extract_strided_slice %295 {offsets = [3, 0], sizes = [1, 256], strides = [1, 1]} : vector<4x256xf32> to vector<1x256xf32>
    %318 = vector.broadcast %316 : vector<4x1xf32> to vector<4x256xf32>
    %319 = vector.broadcast %317 : vector<1x256xf32> to vector<4x256xf32>
    %320 = arith.mulf %318, %319 : vector<4x256xf32>
    %321 = arith.addf %315, %320 : vector<4x256xf32>
    %322 = vector.extract_strided_slice %288 {offsets = [0, 1], sizes = [4, 256], strides = [1, 1]} : vector<4x290xf32> to vector<4x256xf32>
    %c1_53 = arith.constant 1 : index
    %c1_54 = arith.constant 1 : index
    %c0_55 = arith.constant 0 : index
    %c0_56 = arith.constant 0 : index
    %323 = vector.load %arg2[%c1_53, %c1_54, %c0_55, %c0_56] : memref<2x9x4x4xf32, #tpu.memory_space<vmem>>, vector<1x1x4x4xf32>
    %324 = vector.shape_cast %323 : vector<1x1x4x4xf32> to vector<4x4xf32>
    %325 = vector.extract_strided_slice %324 {offsets = [0, 0], sizes = [4, 1], strides = [1, 1]} : vector<4x4xf32> to vector<4x1xf32>
    %326 = vector.extract_strided_slice %322 {offsets = [0, 0], sizes = [1, 256], strides = [1, 1]} : vector<4x256xf32> to vector<1x256xf32>
    %327 = vector.broadcast %325 : vector<4x1xf32> to vector<4x256xf32>
    %328 = vector.broadcast %326 : vector<1x256xf32> to vector<4x256xf32>
    %329 = arith.mulf %327, %328 : vector<4x256xf32>
    %330 = arith.addf %321, %329 : vector<4x256xf32>
    %331 = vector.extract_strided_slice %324 {offsets = [0, 1], sizes = [4, 1], strides = [1, 1]} : vector<4x4xf32> to vector<4x1xf32>
    %332 = vector.extract_strided_slice %322 {offsets = [1, 0], sizes = [1, 256], strides = [1, 1]} : vector<4x256xf32> to vector<1x256xf32>
    %333 = vector.broadcast %331 : vector<4x1xf32> to vector<4x256xf32>
    %334 = vector.broadcast %332 : vector<1x256xf32> to vector<4x256xf32>
    %335 = arith.mulf %333, %334 : vector<4x256xf32>
    %336 = arith.addf %330, %335 : vector<4x256xf32>
    %337 = vector.extract_strided_slice %324 {offsets = [0, 2], sizes = [4, 1], strides = [1, 1]} : vector<4x4xf32> to vector<4x1xf32>
    %338 = vector.extract_strided_slice %322 {offsets = [2, 0], sizes = [1, 256], strides = [1, 1]} : vector<4x256xf32> to vector<1x256xf32>
    %339 = vector.broadcast %337 : vector<4x1xf32> to vector<4x256xf32>
    %340 = vector.broadcast %338 : vector<1x256xf32> to vector<4x256xf32>
    %341 = arith.mulf %339, %340 : vector<4x256xf32>
    %342 = arith.addf %336, %341 : vector<4x256xf32>
    %343 = vector.extract_strided_slice %324 {offsets = [0, 3], sizes = [4, 1], strides = [1, 1]} : vector<4x4xf32> to vector<4x1xf32>
    %344 = vector.extract_strided_slice %322 {offsets = [3, 0], sizes = [1, 256], strides = [1, 1]} : vector<4x256xf32> to vector<1x256xf32>
    %345 = vector.broadcast %343 : vector<4x1xf32> to vector<4x256xf32>
    %346 = vector.broadcast %344 : vector<1x256xf32> to vector<4x256xf32>
    %347 = arith.mulf %345, %346 : vector<4x256xf32>
    %348 = arith.addf %342, %347 : vector<4x256xf32>
    %349 = vector.extract_strided_slice %288 {offsets = [0, 2], sizes = [4, 256], strides = [1, 1]} : vector<4x290xf32> to vector<4x256xf32>
    %cst_57 = arith.constant 0.000000e+00 : f32
    %350 = vector.broadcast %cst_57 : f32 to vector<4x256xf32>
    %351 = arith.select %22, %349, %350 : vector<4x256xi1>, vector<4x256xf32>
    %c1_58 = arith.constant 1 : index
    %c2_59 = arith.constant 2 : index
    %c0_60 = arith.constant 0 : index
    %c0_61 = arith.constant 0 : index
    %352 = vector.load %arg2[%c1_58, %c2_59, %c0_60, %c0_61] : memref<2x9x4x4xf32, #tpu.memory_space<vmem>>, vector<1x1x4x4xf32>
    %353 = vector.shape_cast %352 : vector<1x1x4x4xf32> to vector<4x4xf32>
    %354 = vector.extract_strided_slice %353 {offsets = [0, 0], sizes = [4, 1], strides = [1, 1]} : vector<4x4xf32> to vector<4x1xf32>
    %355 = vector.extract_strided_slice %351 {offsets = [0, 0], sizes = [1, 256], strides = [1, 1]} : vector<4x256xf32> to vector<1x256xf32>
    %356 = vector.broadcast %354 : vector<4x1xf32> to vector<4x256xf32>
    %357 = vector.broadcast %355 : vector<1x256xf32> to vector<4x256xf32>
    %358 = arith.mulf %356, %357 : vector<4x256xf32>
    %359 = arith.addf %348, %358 : vector<4x256xf32>
    %360 = vector.extract_strided_slice %353 {offsets = [0, 1], sizes = [4, 1], strides = [1, 1]} : vector<4x4xf32> to vector<4x1xf32>
    %361 = vector.extract_strided_slice %351 {offsets = [1, 0], sizes = [1, 256], strides = [1, 1]} : vector<4x256xf32> to vector<1x256xf32>
    %362 = vector.broadcast %360 : vector<4x1xf32> to vector<4x256xf32>
    %363 = vector.broadcast %361 : vector<1x256xf32> to vector<4x256xf32>
    %364 = arith.mulf %362, %363 : vector<4x256xf32>
    %365 = arith.addf %359, %364 : vector<4x256xf32>
    %366 = vector.extract_strided_slice %353 {offsets = [0, 2], sizes = [4, 1], strides = [1, 1]} : vector<4x4xf32> to vector<4x1xf32>
    %367 = vector.extract_strided_slice %351 {offsets = [2, 0], sizes = [1, 256], strides = [1, 1]} : vector<4x256xf32> to vector<1x256xf32>
    %368 = vector.broadcast %366 : vector<4x1xf32> to vector<4x256xf32>
    %369 = vector.broadcast %367 : vector<1x256xf32> to vector<4x256xf32>
    %370 = arith.mulf %368, %369 : vector<4x256xf32>
    %371 = arith.addf %365, %370 : vector<4x256xf32>
    %372 = vector.extract_strided_slice %353 {offsets = [0, 3], sizes = [4, 1], strides = [1, 1]} : vector<4x4xf32> to vector<4x1xf32>
    %373 = vector.extract_strided_slice %351 {offsets = [3, 0], sizes = [1, 256], strides = [1, 1]} : vector<4x256xf32> to vector<1x256xf32>
    %374 = vector.broadcast %372 : vector<4x1xf32> to vector<4x256xf32>
    %375 = vector.broadcast %373 : vector<1x256xf32> to vector<4x256xf32>
    %376 = arith.mulf %374, %375 : vector<4x256xf32>
    %377 = arith.addf %371, %376 : vector<4x256xf32>
    %378 = vector.extract_strided_slice %288 {offsets = [0, 16], sizes = [4, 256], strides = [1, 1]} : vector<4x290xf32> to vector<4x256xf32>
    %cst_62 = arith.constant 0.000000e+00 : f32
    %379 = vector.broadcast %cst_62 : f32 to vector<4x256xf32>
    %380 = arith.select %20, %378, %379 : vector<4x256xi1>, vector<4x256xf32>
    %c1_63 = arith.constant 1 : index
    %c3_64 = arith.constant 3 : index
    %c0_65 = arith.constant 0 : index
    %c0_66 = arith.constant 0 : index
    %381 = vector.load %arg2[%c1_63, %c3_64, %c0_65, %c0_66] : memref<2x9x4x4xf32, #tpu.memory_space<vmem>>, vector<1x1x4x4xf32>
    %382 = vector.shape_cast %381 : vector<1x1x4x4xf32> to vector<4x4xf32>
    %383 = vector.extract_strided_slice %382 {offsets = [0, 0], sizes = [4, 1], strides = [1, 1]} : vector<4x4xf32> to vector<4x1xf32>
    %384 = vector.extract_strided_slice %380 {offsets = [0, 0], sizes = [1, 256], strides = [1, 1]} : vector<4x256xf32> to vector<1x256xf32>
    %385 = vector.broadcast %383 : vector<4x1xf32> to vector<4x256xf32>
    %386 = vector.broadcast %384 : vector<1x256xf32> to vector<4x256xf32>
    %387 = arith.mulf %385, %386 : vector<4x256xf32>
    %388 = arith.addf %377, %387 : vector<4x256xf32>
    %389 = vector.extract_strided_slice %382 {offsets = [0, 1], sizes = [4, 1], strides = [1, 1]} : vector<4x4xf32> to vector<4x1xf32>
    %390 = vector.extract_strided_slice %380 {offsets = [1, 0], sizes = [1, 256], strides = [1, 1]} : vector<4x256xf32> to vector<1x256xf32>
    %391 = vector.broadcast %389 : vector<4x1xf32> to vector<4x256xf32>
    %392 = vector.broadcast %390 : vector<1x256xf32> to vector<4x256xf32>
    %393 = arith.mulf %391, %392 : vector<4x256xf32>
    %394 = arith.addf %388, %393 : vector<4x256xf32>
    %395 = vector.extract_strided_slice %382 {offsets = [0, 2], sizes = [4, 1], strides = [1, 1]} : vector<4x4xf32> to vector<4x1xf32>
    %396 = vector.extract_strided_slice %380 {offsets = [2, 0], sizes = [1, 256], strides = [1, 1]} : vector<4x256xf32> to vector<1x256xf32>
    %397 = vector.broadcast %395 : vector<4x1xf32> to vector<4x256xf32>
    %398 = vector.broadcast %396 : vector<1x256xf32> to vector<4x256xf32>
    %399 = arith.mulf %397, %398 : vector<4x256xf32>
    %400 = arith.addf %394, %399 : vector<4x256xf32>
    %401 = vector.extract_strided_slice %382 {offsets = [0, 3], sizes = [4, 1], strides = [1, 1]} : vector<4x4xf32> to vector<4x1xf32>
    %402 = vector.extract_strided_slice %380 {offsets = [3, 0], sizes = [1, 256], strides = [1, 1]} : vector<4x256xf32> to vector<1x256xf32>
    %403 = vector.broadcast %401 : vector<4x1xf32> to vector<4x256xf32>
    %404 = vector.broadcast %402 : vector<1x256xf32> to vector<4x256xf32>
    %405 = arith.mulf %403, %404 : vector<4x256xf32>
    %406 = arith.addf %400, %405 : vector<4x256xf32>
    %407 = vector.extract_strided_slice %288 {offsets = [0, 17], sizes = [4, 256], strides = [1, 1]} : vector<4x290xf32> to vector<4x256xf32>
    %c1_67 = arith.constant 1 : index
    %c4_68 = arith.constant 4 : index
    %c0_69 = arith.constant 0 : index
    %c0_70 = arith.constant 0 : index
    %408 = vector.load %arg2[%c1_67, %c4_68, %c0_69, %c0_70] : memref<2x9x4x4xf32, #tpu.memory_space<vmem>>, vector<1x1x4x4xf32>
    %409 = vector.shape_cast %408 : vector<1x1x4x4xf32> to vector<4x4xf32>
    %410 = vector.extract_strided_slice %409 {offsets = [0, 0], sizes = [4, 1], strides = [1, 1]} : vector<4x4xf32> to vector<4x1xf32>
    %411 = vector.extract_strided_slice %407 {offsets = [0, 0], sizes = [1, 256], strides = [1, 1]} : vector<4x256xf32> to vector<1x256xf32>
    %412 = vector.broadcast %410 : vector<4x1xf32> to vector<4x256xf32>
    %413 = vector.broadcast %411 : vector<1x256xf32> to vector<4x256xf32>
    %414 = arith.mulf %412, %413 : vector<4x256xf32>
    %415 = arith.addf %406, %414 : vector<4x256xf32>
    %416 = vector.extract_strided_slice %409 {offsets = [0, 1], sizes = [4, 1], strides = [1, 1]} : vector<4x4xf32> to vector<4x1xf32>
    %417 = vector.extract_strided_slice %407 {offsets = [1, 0], sizes = [1, 256], strides = [1, 1]} : vector<4x256xf32> to vector<1x256xf32>
    %418 = vector.broadcast %416 : vector<4x1xf32> to vector<4x256xf32>
    %419 = vector.broadcast %417 : vector<1x256xf32> to vector<4x256xf32>
    %420 = arith.mulf %418, %419 : vector<4x256xf32>
    %421 = arith.addf %415, %420 : vector<4x256xf32>
    %422 = vector.extract_strided_slice %409 {offsets = [0, 2], sizes = [4, 1], strides = [1, 1]} : vector<4x4xf32> to vector<4x1xf32>
    %423 = vector.extract_strided_slice %407 {offsets = [2, 0], sizes = [1, 256], strides = [1, 1]} : vector<4x256xf32> to vector<1x256xf32>
    %424 = vector.broadcast %422 : vector<4x1xf32> to vector<4x256xf32>
    %425 = vector.broadcast %423 : vector<1x256xf32> to vector<4x256xf32>
    %426 = arith.mulf %424, %425 : vector<4x256xf32>
    %427 = arith.addf %421, %426 : vector<4x256xf32>
    %428 = vector.extract_strided_slice %409 {offsets = [0, 3], sizes = [4, 1], strides = [1, 1]} : vector<4x4xf32> to vector<4x1xf32>
    %429 = vector.extract_strided_slice %407 {offsets = [3, 0], sizes = [1, 256], strides = [1, 1]} : vector<4x256xf32> to vector<1x256xf32>
    %430 = vector.broadcast %428 : vector<4x1xf32> to vector<4x256xf32>
    %431 = vector.broadcast %429 : vector<1x256xf32> to vector<4x256xf32>
    %432 = arith.mulf %430, %431 : vector<4x256xf32>
    %433 = arith.addf %427, %432 : vector<4x256xf32>
    %434 = vector.extract_strided_slice %288 {offsets = [0, 18], sizes = [4, 256], strides = [1, 1]} : vector<4x290xf32> to vector<4x256xf32>
    %cst_71 = arith.constant 0.000000e+00 : f32
    %435 = vector.broadcast %cst_71 : f32 to vector<4x256xf32>
    %436 = arith.select %22, %434, %435 : vector<4x256xi1>, vector<4x256xf32>
    %c1_72 = arith.constant 1 : index
    %c5_73 = arith.constant 5 : index
    %c0_74 = arith.constant 0 : index
    %c0_75 = arith.constant 0 : index
    %437 = vector.load %arg2[%c1_72, %c5_73, %c0_74, %c0_75] : memref<2x9x4x4xf32, #tpu.memory_space<vmem>>, vector<1x1x4x4xf32>
    %438 = vector.shape_cast %437 : vector<1x1x4x4xf32> to vector<4x4xf32>
    %439 = vector.extract_strided_slice %438 {offsets = [0, 0], sizes = [4, 1], strides = [1, 1]} : vector<4x4xf32> to vector<4x1xf32>
    %440 = vector.extract_strided_slice %436 {offsets = [0, 0], sizes = [1, 256], strides = [1, 1]} : vector<4x256xf32> to vector<1x256xf32>
    %441 = vector.broadcast %439 : vector<4x1xf32> to vector<4x256xf32>
    %442 = vector.broadcast %440 : vector<1x256xf32> to vector<4x256xf32>
    %443 = arith.mulf %441, %442 : vector<4x256xf32>
    %444 = arith.addf %433, %443 : vector<4x256xf32>
    %445 = vector.extract_strided_slice %438 {offsets = [0, 1], sizes = [4, 1], strides = [1, 1]} : vector<4x4xf32> to vector<4x1xf32>
    %446 = vector.extract_strided_slice %436 {offsets = [1, 0], sizes = [1, 256], strides = [1, 1]} : vector<4x256xf32> to vector<1x256xf32>
    %447 = vector.broadcast %445 : vector<4x1xf32> to vector<4x256xf32>
    %448 = vector.broadcast %446 : vector<1x256xf32> to vector<4x256xf32>
    %449 = arith.mulf %447, %448 : vector<4x256xf32>
    %450 = arith.addf %444, %449 : vector<4x256xf32>
    %451 = vector.extract_strided_slice %438 {offsets = [0, 2], sizes = [4, 1], strides = [1, 1]} : vector<4x4xf32> to vector<4x1xf32>
    %452 = vector.extract_strided_slice %436 {offsets = [2, 0], sizes = [1, 256], strides = [1, 1]} : vector<4x256xf32> to vector<1x256xf32>
    %453 = vector.broadcast %451 : vector<4x1xf32> to vector<4x256xf32>
    %454 = vector.broadcast %452 : vector<1x256xf32> to vector<4x256xf32>
    %455 = arith.mulf %453, %454 : vector<4x256xf32>
    %456 = arith.addf %450, %455 : vector<4x256xf32>
    %457 = vector.extract_strided_slice %438 {offsets = [0, 3], sizes = [4, 1], strides = [1, 1]} : vector<4x4xf32> to vector<4x1xf32>
    %458 = vector.extract_strided_slice %436 {offsets = [3, 0], sizes = [1, 256], strides = [1, 1]} : vector<4x256xf32> to vector<1x256xf32>
    %459 = vector.broadcast %457 : vector<4x1xf32> to vector<4x256xf32>
    %460 = vector.broadcast %458 : vector<1x256xf32> to vector<4x256xf32>
    %461 = arith.mulf %459, %460 : vector<4x256xf32>
    %462 = arith.addf %456, %461 : vector<4x256xf32>
    %463 = vector.extract_strided_slice %288 {offsets = [0, 32], sizes = [4, 256], strides = [1, 1]} : vector<4x290xf32> to vector<4x256xf32>
    %cst_76 = arith.constant 0.000000e+00 : f32
    %464 = vector.broadcast %cst_76 : f32 to vector<4x256xf32>
    %465 = arith.select %20, %463, %464 : vector<4x256xi1>, vector<4x256xf32>
    %c1_77 = arith.constant 1 : index
    %c6_78 = arith.constant 6 : index
    %c0_79 = arith.constant 0 : index
    %c0_80 = arith.constant 0 : index
    %466 = vector.load %arg2[%c1_77, %c6_78, %c0_79, %c0_80] : memref<2x9x4x4xf32, #tpu.memory_space<vmem>>, vector<1x1x4x4xf32>
    %467 = vector.shape_cast %466 : vector<1x1x4x4xf32> to vector<4x4xf32>
    %468 = vector.extract_strided_slice %467 {offsets = [0, 0], sizes = [4, 1], strides = [1, 1]} : vector<4x4xf32> to vector<4x1xf32>
    %469 = vector.extract_strided_slice %465 {offsets = [0, 0], sizes = [1, 256], strides = [1, 1]} : vector<4x256xf32> to vector<1x256xf32>
    %470 = vector.broadcast %468 : vector<4x1xf32> to vector<4x256xf32>
    %471 = vector.broadcast %469 : vector<1x256xf32> to vector<4x256xf32>
    %472 = arith.mulf %470, %471 : vector<4x256xf32>
    %473 = arith.addf %462, %472 : vector<4x256xf32>
    %474 = vector.extract_strided_slice %467 {offsets = [0, 1], sizes = [4, 1], strides = [1, 1]} : vector<4x4xf32> to vector<4x1xf32>
    %475 = vector.extract_strided_slice %465 {offsets = [1, 0], sizes = [1, 256], strides = [1, 1]} : vector<4x256xf32> to vector<1x256xf32>
    %476 = vector.broadcast %474 : vector<4x1xf32> to vector<4x256xf32>
    %477 = vector.broadcast %475 : vector<1x256xf32> to vector<4x256xf32>
    %478 = arith.mulf %476, %477 : vector<4x256xf32>
    %479 = arith.addf %473, %478 : vector<4x256xf32>
    %480 = vector.extract_strided_slice %467 {offsets = [0, 2], sizes = [4, 1], strides = [1, 1]} : vector<4x4xf32> to vector<4x1xf32>
    %481 = vector.extract_strided_slice %465 {offsets = [2, 0], sizes = [1, 256], strides = [1, 1]} : vector<4x256xf32> to vector<1x256xf32>
    %482 = vector.broadcast %480 : vector<4x1xf32> to vector<4x256xf32>
    %483 = vector.broadcast %481 : vector<1x256xf32> to vector<4x256xf32>
    %484 = arith.mulf %482, %483 : vector<4x256xf32>
    %485 = arith.addf %479, %484 : vector<4x256xf32>
    %486 = vector.extract_strided_slice %467 {offsets = [0, 3], sizes = [4, 1], strides = [1, 1]} : vector<4x4xf32> to vector<4x1xf32>
    %487 = vector.extract_strided_slice %465 {offsets = [3, 0], sizes = [1, 256], strides = [1, 1]} : vector<4x256xf32> to vector<1x256xf32>
    %488 = vector.broadcast %486 : vector<4x1xf32> to vector<4x256xf32>
    %489 = vector.broadcast %487 : vector<1x256xf32> to vector<4x256xf32>
    %490 = arith.mulf %488, %489 : vector<4x256xf32>
    %491 = arith.addf %485, %490 : vector<4x256xf32>
    %492 = vector.extract_strided_slice %288 {offsets = [0, 33], sizes = [4, 256], strides = [1, 1]} : vector<4x290xf32> to vector<4x256xf32>
    %c1_81 = arith.constant 1 : index
    %c7_82 = arith.constant 7 : index
    %c0_83 = arith.constant 0 : index
    %c0_84 = arith.constant 0 : index
    %493 = vector.load %arg2[%c1_81, %c7_82, %c0_83, %c0_84] : memref<2x9x4x4xf32, #tpu.memory_space<vmem>>, vector<1x1x4x4xf32>
    %494 = vector.shape_cast %493 : vector<1x1x4x4xf32> to vector<4x4xf32>
    %495 = vector.extract_strided_slice %494 {offsets = [0, 0], sizes = [4, 1], strides = [1, 1]} : vector<4x4xf32> to vector<4x1xf32>
    %496 = vector.extract_strided_slice %492 {offsets = [0, 0], sizes = [1, 256], strides = [1, 1]} : vector<4x256xf32> to vector<1x256xf32>
    %497 = vector.broadcast %495 : vector<4x1xf32> to vector<4x256xf32>
    %498 = vector.broadcast %496 : vector<1x256xf32> to vector<4x256xf32>
    %499 = arith.mulf %497, %498 : vector<4x256xf32>
    %500 = arith.addf %491, %499 : vector<4x256xf32>
    %501 = vector.extract_strided_slice %494 {offsets = [0, 1], sizes = [4, 1], strides = [1, 1]} : vector<4x4xf32> to vector<4x1xf32>
    %502 = vector.extract_strided_slice %492 {offsets = [1, 0], sizes = [1, 256], strides = [1, 1]} : vector<4x256xf32> to vector<1x256xf32>
    %503 = vector.broadcast %501 : vector<4x1xf32> to vector<4x256xf32>
    %504 = vector.broadcast %502 : vector<1x256xf32> to vector<4x256xf32>
    %505 = arith.mulf %503, %504 : vector<4x256xf32>
    %506 = arith.addf %500, %505 : vector<4x256xf32>
    %507 = vector.extract_strided_slice %494 {offsets = [0, 2], sizes = [4, 1], strides = [1, 1]} : vector<4x4xf32> to vector<4x1xf32>
    %508 = vector.extract_strided_slice %492 {offsets = [2, 0], sizes = [1, 256], strides = [1, 1]} : vector<4x256xf32> to vector<1x256xf32>
    %509 = vector.broadcast %507 : vector<4x1xf32> to vector<4x256xf32>
    %510 = vector.broadcast %508 : vector<1x256xf32> to vector<4x256xf32>
    %511 = arith.mulf %509, %510 : vector<4x256xf32>
    %512 = arith.addf %506, %511 : vector<4x256xf32>
    %513 = vector.extract_strided_slice %494 {offsets = [0, 3], sizes = [4, 1], strides = [1, 1]} : vector<4x4xf32> to vector<4x1xf32>
    %514 = vector.extract_strided_slice %492 {offsets = [3, 0], sizes = [1, 256], strides = [1, 1]} : vector<4x256xf32> to vector<1x256xf32>
    %515 = vector.broadcast %513 : vector<4x1xf32> to vector<4x256xf32>
    %516 = vector.broadcast %514 : vector<1x256xf32> to vector<4x256xf32>
    %517 = arith.mulf %515, %516 : vector<4x256xf32>
    %518 = arith.addf %512, %517 : vector<4x256xf32>
    %519 = vector.extract_strided_slice %288 {offsets = [0, 34], sizes = [4, 256], strides = [1, 1]} : vector<4x290xf32> to vector<4x256xf32>
    %cst_85 = arith.constant 0.000000e+00 : f32
    %520 = vector.broadcast %cst_85 : f32 to vector<4x256xf32>
    %521 = arith.select %22, %519, %520 : vector<4x256xi1>, vector<4x256xf32>
    %c1_86 = arith.constant 1 : index
    %c8_87 = arith.constant 8 : index
    %c0_88 = arith.constant 0 : index
    %c0_89 = arith.constant 0 : index
    %522 = vector.load %arg2[%c1_86, %c8_87, %c0_88, %c0_89] : memref<2x9x4x4xf32, #tpu.memory_space<vmem>>, vector<1x1x4x4xf32>
    %523 = vector.shape_cast %522 : vector<1x1x4x4xf32> to vector<4x4xf32>
    %524 = vector.extract_strided_slice %523 {offsets = [0, 0], sizes = [4, 1], strides = [1, 1]} : vector<4x4xf32> to vector<4x1xf32>
    %525 = vector.extract_strided_slice %521 {offsets = [0, 0], sizes = [1, 256], strides = [1, 1]} : vector<4x256xf32> to vector<1x256xf32>
    %526 = vector.broadcast %524 : vector<4x1xf32> to vector<4x256xf32>
    %527 = vector.broadcast %525 : vector<1x256xf32> to vector<4x256xf32>
    %528 = arith.mulf %526, %527 : vector<4x256xf32>
    %529 = arith.addf %518, %528 : vector<4x256xf32>
    %530 = vector.extract_strided_slice %523 {offsets = [0, 1], sizes = [4, 1], strides = [1, 1]} : vector<4x4xf32> to vector<4x1xf32>
    %531 = vector.extract_strided_slice %521 {offsets = [1, 0], sizes = [1, 256], strides = [1, 1]} : vector<4x256xf32> to vector<1x256xf32>
    %532 = vector.broadcast %530 : vector<4x1xf32> to vector<4x256xf32>
    %533 = vector.broadcast %531 : vector<1x256xf32> to vector<4x256xf32>
    %534 = arith.mulf %532, %533 : vector<4x256xf32>
    %535 = arith.addf %529, %534 : vector<4x256xf32>
    %536 = vector.extract_strided_slice %523 {offsets = [0, 2], sizes = [4, 1], strides = [1, 1]} : vector<4x4xf32> to vector<4x1xf32>
    %537 = vector.extract_strided_slice %521 {offsets = [2, 0], sizes = [1, 256], strides = [1, 1]} : vector<4x256xf32> to vector<1x256xf32>
    %538 = vector.broadcast %536 : vector<4x1xf32> to vector<4x256xf32>
    %539 = vector.broadcast %537 : vector<1x256xf32> to vector<4x256xf32>
    %540 = arith.mulf %538, %539 : vector<4x256xf32>
    %541 = arith.addf %535, %540 : vector<4x256xf32>
    %542 = vector.extract_strided_slice %523 {offsets = [0, 3], sizes = [4, 1], strides = [1, 1]} : vector<4x4xf32> to vector<4x1xf32>
    %543 = vector.extract_strided_slice %521 {offsets = [3, 0], sizes = [1, 256], strides = [1, 1]} : vector<4x256xf32> to vector<1x256xf32>
    %544 = vector.broadcast %542 : vector<4x1xf32> to vector<4x256xf32>
    %545 = vector.broadcast %543 : vector<1x256xf32> to vector<4x256xf32>
    %546 = arith.mulf %544, %545 : vector<4x256xf32>
    %547 = arith.addf %541, %546 : vector<4x256xf32>
    %548 = arith.addf %547, %1 : vector<4x256xf32>
    %c0_90 = arith.constant 0 : index
    %c0_91 = arith.constant 0 : index
    %c0_92 = arith.constant 0 : index
    %549 = vector.load %arg4[%c0_90, %c0_91, %c0_92] : memref<1x4x256xf32, #tpu.memory_space<vmem>>, vector<1x4x256xf32>
    %550 = vector.shape_cast %549 : vector<1x4x256xf32> to vector<4x256xf32>
    %551 = vector.shape_cast %548 : vector<4x256xf32> to vector<1x4x256xf32>
    tpu.vector_store %arg4[%c0_90, %c0_91, %c0_92], %551 {strides = array<i32>} : memref<1x4x256xf32, #tpu.memory_space<vmem>>, vector<1x4x256xf32>,
    return
  }
  func.func @transform_0(%arg0: i32) -> (i32, i32, i32) {
    %c0_i32 = arith.constant 0 : i32
    %c0_i32_0 = arith.constant 0 : i32
    %c0_i32_1 = arith.constant 0 : i32
    return %arg0, %c0_i32, %c0_i32_0 : i32, i32, i32
  }
  func.func @transform_1(%arg0: i32) -> (i32, i32, i32, i32) {
    %c0_i32 = arith.constant 0 : i32
    %c0_i32_0 = arith.constant 0 : i32
    %c0_i32_1 = arith.constant 0 : i32
    %c0_i32_2 = arith.constant 0 : i32
    %c0_i32_3 = arith.constant 0 : i32
    return %c0_i32, %c0_i32_0, %c0_i32_1, %c0_i32_2 : i32, i32, i32, i32
  }
  func.func @transform_2(%arg0: i32) -> (i32, i32, i32) {
    %c0_i32 = arith.constant 0 : i32
    %c0_i32_0 = arith.constant 0 : i32
    %c0_i32_1 = arith.constant 0 : i32
    %c0_i32_2 = arith.constant 0 : i32
    return %c0_i32, %c0_i32_0, %c0_i32_1 : i32, i32, i32
  }
  func.func @transform_3(%arg0: i32) -> (i32, i32, i32) {
    %c0_i32 = arith.constant 0 : i32
    %c0_i32_0 = arith.constant 0 : i32
    %c0_i32_1 = arith.constant 0 : i32
    return %arg0, %c0_i32, %c0_i32_0 : i32, i32, i32
  }
}

</mosaic_0001>

<bundles_post_ra>
// kernel: residual_conv_unit.1
= control target key start
LH: loop header
LB: loop body
LE: loop exit
PB: predicated region body
PF: predicated region fallthrough
CT: control target
= control target key end

     0   :  { %s2042_s12 = smov 0   ;;  %s3152_s0 = inlined_call_operand.vmem [shape: f32[2,4,256], index: 0, kind: input, shape index: {}]   ;;  %s3153_s1 = inlined_call_operand.vmem [shape: f32[2,9,4,4], index: 1, kind: input, shape index: {}]   ;;  %s3154_s2 = inlined_call_operand.vmem [shape: f32[2,4,1], index: 2, kind: input, shape index: {}]   ;;  %s3155_s3 = inlined_call_operand.vmem [shape: f32[2,4,256], index: 3, kind: output, shape index: {}]  }
   0x1 LB: > { %s1890_s13 = sadd.s32 4294967295, %s2007_s12   ;;  %p1894_p0 = scmp.ge.s32.totalorder %s2007_s12, 1  ;;  %s2007_s12 = sphi %s2042_s12, %s13_s12  }
   0x2   : > { %p137_p1 = scmp.lt.s32.totalorder %s2007_s12, 3 }
   0x4   : > { %p138_p2 = pnand %p1894_p0, %p137_p1 }
   0x6   : > { %141 = sbr.rel (%p138_p2) target bundleno = 899 (0x383), region = 32 }
   0xb   : > { %v217_v0 = vld [vmem:[%s3154_s2] sm:$0xf]  ;;  %p161_p3 = scmp.lt.s32.totalorder %s1890_s13, 1  ;;  %v3158_v1 = vmov 0   ;;  %s2010_s22 = smov 17   ;;  %v3162_v6 = vmov 2   ;;  %v3164_v20 = vlaneseq }
   0xc   : > { %1942 = vset.pattern.permute.xlu1 %v3158_v1  ;;  %1945 = vset.pattern.permute.xlu0 %v3158_v1  ;;  %v225_v2 = vld [vmem:[%s3153_s1] sm:$0xf]  ;;  %v1899_v7 = vld [vmem:[%s3153_s1 + $0x4] sm:$0xf]  ;;  %v3160_v8 = vmov 3   ;;  %v3156_v10 = vmov 1  }
   0xd   : > { %220 = vperm.xlu1 %1942, %v217_v0   ;;  %s3219_s13 = smov (!%p161_p3, %s1890_s13), 1  ;;  %v2079_v9 = vld [vmem:[%s3153_s1 + $0x8] sm:$0xf]  ;;  %v1902_v11 = vld [vmem:[%s3153_s1 + $0x10] sm:$0xf]  ;;  %vm210_vm0 = vcmask 138240  }
   0xe   : > { %s1919_s18 = sshll.u32 %s3219_s13, 3  ;;  %v2097_v12 = vld [vmem:[%s3153_s1 + $0xc] sm:$0xf]  ;;  %v2109_v13 = vld [vmem:[%s3153_s1 + $0x14] sm:$0xf]  ;;  %s2014_s6 = smov 126  }
   0xf   : > { %s2066_s21 = scalar_lea.vmem %s3152_s0, %s1919_s18  ;;  %s2015_s7 = smov 112   ;;  %v232_v23 = vshrl.u32 %v3164_v20, 7  ;;  %vm322_vm3 = vcmask 1039360   ;;  %vm439_vm4 = vcmask 1031168   ;;  %vm519_vm7 = vcmask 916480  }
  0x10   : > { %v171_v3 = vld [vmem:[%s2066_s21] sm:$0xff]  ;;  %s2016_s8 = smov 110   ;;  %s2017_s9 = smov 127   ;;  %vm612_vm8 = vcmask 908288   ;;  %vm691_vm9 = vcmask 900096   ;;  %vm771_vm10 = vcmask 785408  }
  0x11   : > { %228 = vperm.xlu1 %1942, %v225_v2   ;;  %v203_v4 = vmax.f32 %v171_v3, 0.0  ;;  %v2146_v24 = vsub.s32 1, %v232_v23  ;;  %v2148_v25 = vsub.s32 0, %v232_v23  ;;  %v2162_v29 = vsub.s32 2, %v232_v23  ;;  %s2018_s10 = smov 111   ;;  %s2019_s11 = smov 96  }
  0x12   : > { %v2173_v35 = vsub.s32 3, %v232_v23  ;;  %s2020_s19 = smov 95   ;;  %s2021_s20 = smov 94   ;;  %vm864_vm11 = vcmask 777216   ;;  %vm943_vm12 = vcmask 769024  }
  0x13   : > { %206 = vrot.lane.b32.xlu0 %v203_v4, %s2010_s22  ;;  %v205_v5 = vcombine.high %v203_v4, %v203_v4 }
  0x15   : > { %1943 = vset.pattern.permute.xlu1 %v3162_v6 }
  0x16   : > { %260 = vperm.xlu1 %1943, %v225_v2  }
  0x17   : > { %208 = vrot.lane.b32.xlu0 %v205_v5, %s2010_s22 }
  0x1a   : > { %1944 = vset.pattern.permute.xlu1 %v3160_v8 }
  0x1b   : > { %276 = vperm.xlu1 %1944, %v225_v2   ;;  %295 = vperm.xlu0 %1945, %v1899_v7  }
  0x1f   : > { %1946 = vset.pattern.permute.xlu1 %v3156_v10  ;;  %1950 = vset.pattern.permute.xlu0 %v3162_v6 }
  0x20   : > { %330 = vperm.xlu1 %1946, %v1899_v7   ;;  %482 = vperm.xlu0 %1950, %v2079_v9  }
  0x24   : > { %1947 = vset.pattern.permute.xlu1 %v3162_v6  ;;  %1951 = vset.pattern.permute.xlu0 %v3156_v10 }
  0x25   : > { %364 = vperm.xlu1 %1947, %v1899_v7   ;;  %244 = vperm.xlu0 %1951, %v225_v2  }
  0x29   : > { %1948 = vset.pattern.permute.xlu1 %v3160_v8  ;;  %620 = vperm.xlu0 %1951, %v1902_v11  }
  0x2a   : > { %398 = vperm.xlu1 %1948, %v1899_v7  }
  0x2e   : > { %1949 = vset.pattern.permute.xlu1 %v3156_v10 }
  0x2f   : > { %466 = vperm.xlu1 %1949, %v2079_v9  }
  0x33   : > { %1952 = vset.pattern.permute.xlu1 %v3160_v8 }
  0x34   : > { %498 = vperm.xlu1 %1952, %v2079_v9  }
  0x38   : > { %1953 = vset.pattern.permute.xlu1 %v3156_v10 }
  0x39   : > { %546 = vperm.xlu1 %1953, %v2097_v12  }
  0x3d   : > { %1954 = vset.pattern.permute.xlu1 %v3162_v6 }
  0x3e   : > { %562 = vperm.xlu1 %1954, %v2097_v12  }
  0x42   : > { %1955 = vset.pattern.permute.xlu1 %v3158_v1 }
  0x43   : > { %597 = vperm.xlu1 %1955, %v1902_v11  }
  0x47   : > { %1956 = vset.pattern.permute.xlu1 %v3162_v6 }
  0x48   : > { %642 = vperm.xlu1 %1956, %v1902_v11  }
  0x4c   : > { %1957 = vset.pattern.permute.xlu1 %v3160_v8 }
  0x4d   : > { %664 = vperm.xlu1 %1957, %v1902_v11  }
  0x51   : > { %1958 = vset.pattern.permute.xlu1 %v3156_v10 }
  0x52   : > { %718 = vperm.xlu1 %1958, %v2109_v13  }
  0x56   : > { %1959 = vset.pattern.permute.xlu1 %v3162_v6 }
  0x57   : > { %734 = vperm.xlu1 %1959, %v2109_v13  }
  0x5b   : > { %1960 = vset.pattern.permute.xlu1 %v3158_v1 }
  0x85   : > { %v207_v14 = vpop.permute.xlu0 %206 }
  0x86   : > { %v2117_v15 = vsel %vm210_vm0, 0.0, %v207_v14 }
  0x87   : > { %433 = vrot.lane.b32.xlu1 %v2117_v15, %s2014_s6  ;;  %v2156_v27 = vrot.slane %v2117_v15, %v2146_v24  ;;  %v2160_v28 = vrot.slane %v2117_v15, %v2148_v25  ;;  %v2170_v34 = vrot.slane %v2117_v15, %v2162_v29  ;;  %v2179_v38 = vrot.slane %v2117_v15, %v2173_v35 }
  0x88   : > { %v2119_v16 = vpop.permute.xlu1 %220 }
  0x89   : > { %v209_v17 = vpop.permute.xlu0 %208 }
  0x8a   : > { %v2124_v18 = vsel %vm210_vm0, %v207_v14, %v209_v17  ;;  %v2137_v21 = vsel %vm210_vm0, %v209_v17, 0.0 }
  0x8b   : > { %513 = vrot.lane.b32.xlu1 %v2117_v15, %s2015_s7  ;;  %435 = vrot.lane.b32.xlu0 %v2124_v18, %s2014_s6  ;;  %v2201_v52 = vrot.slane %v2124_v18, %v2148_v25  ;;  %v2209_v55 = vrot.slane %v2124_v18, %v2146_v24  ;;  %v2215_v58 = vrot.slane %v2137_v21, %v2148_v25 }
  0x8c   : > { %v2126_v19 = vpop.permute.xlu1 %228  ;;  %v2221_v60 = vrot.slane %v2124_v18, %v2162_v29  ;;  %v2227_v62 = vrot.slane %v2137_v21, %v2146_v24  ;;  %v2233_v0 = vrot.slane %v2124_v18, %v2173_v35  ;;  %v2239_v3 = vrot.slane %v2137_v21, %v2162_v29 }
  0x8d   : > { %v2247_v7 = vrot.slane %v2137_v21, %v2173_v35 }
  0x8f   : > { %685 = vrot.lane.b32.xlu1 %v2117_v15, %s2016_s8  ;;  %515 = vrot.lane.b32.xlu0 %v2124_v18, %s2015_s7 }
  0x91   : > { %v2139_v22 = vpop.permute.xlu1 %260 }
  0x93   : > { %437 = vrot.lane.b32.xlu1 %v2137_v21, %s2014_s6  ;;  %687 = vrot.lane.b32.xlu0 %v2124_v18, %s2016_s8 }
  0x96   : > { %v2150_v26 = vpop.permute.xlu1 %276  ;;  %v296_v30 = vpop.permute.xlu0 %295 }
  0x97   : > { %517 = vrot.lane.b32.xlu1 %v2137_v21, %s2015_s7  ;;  %v310_v33 = vmul.f32 %v2160_v28, %v296_v30  ;;  %v311_v54 = vmul.f32 %v2201_v52, %v296_v30  ;;  %v312_v61 = vmul.f32 %v2215_v58, %v296_v30 }
  0x9b   : > { %v331_v31 = vpop.permute.xlu1 %330  ;;  %689 = vrot.lane.b32.xlu1 %v2137_v21, %s2016_s8  ;;  %v2188_v43 = vpop.permute.xlu0 %482 }
  0x9c   : > { %v345_v32 = vmul.f32 %v2156_v27, %v331_v31  ;;  %v346_v59 = vmul.f32 %v2209_v55, %v331_v31  ;;  %v347_v2 = vmul.f32 %v2227_v62, %v331_v31 }
  0x9e   : > { %351 = vrot.lane.b32.xlu0 %v345_v32, %s2017_s9 }
  0x9f   : > { %316 = vrot.lane.b32.xlu1 %v310_v33, %s2017_s9 }
  0xa0   : > { %v365_v36 = vpop.permute.xlu1 %364  ;;  %v2194_v46 = vpop.permute.xlu0 %244 }
  0xa1   : > { %v379_v37 = vmul.f32 %v2170_v34, %v365_v36  ;;  %v380_v63 = vmul.f32 %v2221_v60, %v365_v36  ;;  %v381_v5 = vmul.f32 %v2239_v3, %v365_v36  ;;  %v1905_v36 = vld [vmem:[%s3153_s1 + $0x1c] sm:$0xf] }
  0xa3   : > { %385 = vrot.lane.b32.xlu0 %v379_v37, %s2017_s9 }
  0xa4   : > { %v621_v49 = vpop.permute.xlu0 %620 }
  0xa5   : > { %v399_v39 = vpop.permute.xlu1 %398  ;;  %v623_v51 = vmul.f32 %v621_v49, %v2156_v27  ;;  %v624_v17 = vmul.f32 %v621_v49, %v2209_v55  ;;  %v625_v31 = vmul.f32 %v621_v49, %v2227_v62 }
  0xa6   : > { %v413_v40 = vmul.f32 %v2179_v38, %v399_v39  ;;  %v414_v4 = vmul.f32 %v2233_v0, %v399_v39  ;;  %v415_v14 = vmul.f32 %v2247_v7, %v399_v39  ;;  %v1904_v39 = vld [vmem:[%s3153_s1 + $0x18] sm:$0xf] }
  0xa8   : > { %419 = vrot.lane.b32.xlu0 %v413_v40, %s2017_s9 }
  0xaa   : > { %v2184_v41 = vpop.permute.xlu1 %466 }
  0xaf   : > { %v2186_v42 = vpop.permute.xlu1 %498 }
  0xb4   : > { %v2190_v44 = vpop.permute.xlu1 %546 }
  0xb9   : > { %v2192_v45 = vpop.permute.xlu1 %562 }
  0xbe   : > { %v598_v47 = vpop.permute.xlu1 %597 }
  0xbf   : > { %v600_v48 = vmul.f32 %v598_v47, %v2160_v28  ;;  %v602_v11 = vmul.f32 %v598_v47, %v2215_v58  ;;  %v601_v23 = vmul.f32 %v598_v47, %v2201_v52 }
  0xc1   : > { %606 = vrot.lane.b32.xlu1 %v600_v48, %s2018_s10 }
  0xc3   : > { %v643_v50 = vpop.permute.xlu1 %642 }
  0xc4   : > { %v645_v53 = vmul.f32 %v643_v50, %v2170_v34  ;;  %v646_v30 = vmul.f32 %v643_v50, %v2221_v60  ;;  %v647_v33 = vmul.f32 %v643_v50, %v2239_v3 }
  0xc5   : > { %629 = vrot.lane.b32.xlu1 %v623_v51, %s2018_s10 }
  0xc6   : > { %651 = vrot.lane.b32.xlu0 %v645_v53, %s2018_s10 }
  0xc8   : > { %v665_v56 = vpop.permute.xlu1 %664 }
  0xc9   : > { %318 = vrot.lane.b32.xlu1 %v311_v54, %s2017_s9  ;;  %v667_v57 = vmul.f32 %v665_v56, %v2179_v38  ;;  %v668_v32 = vmul.f32 %v665_v56, %v2233_v0  ;;  %v669_v37 = vmul.f32 %v665_v56, %v2247_v7 }
  0xcb   : > { %673 = vrot.lane.b32.xlu0 %v667_v57, %s2018_s10 }
  0xcd   : > { %353 = vrot.lane.b32.xlu1 %v346_v59, %s2017_s9 }
  0xcf   : > { %320 = vrot.lane.b32.xlu0 %v312_v61, %s2017_s9 }
  0xd1   : > { %387 = vrot.lane.b32.xlu1 %v380_v63, %s2017_s9 }
  0xd3   : > { %355 = vrot.lane.b32.xlu0 %v347_v2, %s2017_s9 }
  0xd5   : > { %421 = vrot.lane.b32.xlu1 %v414_v4, %s2017_s9 }
  0xd7   : > { %389 = vrot.lane.b32.xlu0 %v381_v5, %s2017_s9 }
  0xd9   : > { %610 = vrot.lane.b32.xlu1 %v602_v11, %s2018_s10 }
  0xdb   : > { %423 = vrot.lane.b32.xlu0 %v415_v14, %s2017_s9 }
  0xdd   : > { %631 = vrot.lane.b32.xlu1 %v624_v17, %s2018_s10 }
  0xdf   : > { %608 = vrot.lane.b32.xlu0 %v601_v23, %s2018_s10 }
  0xe1   : > { %653 = vrot.lane.b32.xlu1 %v646_v30, %s2018_s10 }
  0xe3   : > { %633 = vrot.lane.b32.xlu0 %v625_v31, %s2018_s10 }
  0xe5   : > { %675 = vrot.lane.b32.xlu1 %v668_v32, %s2018_s10 }
  0xe7   : > { %655 = vrot.lane.b32.xlu0 %v647_v33, %s2018_s10 }
  0xe9   : > { %765 = vrot.lane.b32.xlu1 %v2117_v15, %s2019_s11 }
  0xeb   : > { %769 = vrot.lane.b32.xlu0 %v2137_v21, %s2019_s11 }
  0xed   : > { %767 = vrot.lane.b32.xlu1 %v2124_v18, %s2019_s11 }
  0xef   : > { %872 = vperm.xlu0 %1951, %v1905_v36  }
  0xf1   : > { %849 = vperm.xlu1 %1960, %v1905_v36  }
  0xf3   : > { %1961 = vset.pattern.permute.xlu0 %v3158_v1 }
  0xf4   : > { %450 = vperm.xlu0 %1961, %v2079_v9   ;;  %v2287_v9 = vpop.permute.xlu1 %718 }
  0xf5   : > { %1962 = vset.pattern.permute.xlu1 %v3162_v6  ;;  %3173 = vst [vmem:[#allocation2_spill] sm:$0xff] %v2287_v9 }
  0xf6   : > { %894 = vperm.xlu1 %1962, %v1905_v36  }
  0xf8   : > { %530 = vperm.xlu0 %1961, %v2097_v12   ;;  %v2291_v40 = vpop.permute.xlu1 %734 }
  0xf9   : > { %3174 = vst [vmem:[#allocation3_spill] sm:$0xff] %v2291_v40 }
  0xfa   : > { %1963 = vset.pattern.permute.xlu1 %v3160_v8 }
  0xfb   : > { %916 = vperm.xlu1 %1963, %v1905_v36  }
  0xfc   : > { %677 = vrot.lane.b32.xlu0 %v669_v37, %s2018_s10  ;;  %v2296_v47 = vpop.permute.xlu1 %433 }
  0xfd   : > { %v2301_v49 = vpop.permute.xlu0 %435 }
  0xff   : > { %1965 = vset.pattern.permute.xlu1 %v3156_v10 }
 0x100   : > { %702 = vperm.xlu0 %1961, %v2109_v13   ;;  %798 = vperm.xlu1 %1965, %v1904_v39   ;;  %v2298_v48 = vpop.permute.xlu1 %513 }
 0x101   : > { %v2305_v51 = vpop.permute.xlu0 %515 }
 0x104   : > { %782 = vperm.xlu0 %1961, %v1904_v39   ;;  %1966 = vset.pattern.permute.xlu1 %v3162_v6  ;;  %v2303_v50 = vpop.permute.xlu1 %685 }
 0x105   : > { %814 = vperm.xlu1 %1966, %v1904_v39   ;;  %3175 = vst [vmem:[#allocation4_spill] sm:$0xff] %v2303_v50 }
 0x108   : > { %1964 = vset.pattern.permute.xlu0 %v3160_v8  ;;  %v2307_v53 = vpop.permute.xlu1 %437 }
 0x109   : > { %578 = vperm.xlu0 %1964, %v2097_v12   ;;  %1967 = vset.pattern.permute.xlu1 %v3158_v1  ;;  %v2309_v12 = vpop.permute.xlu0 %687 }
 0x10a   : > { %3176 = vst [vmem:[#allocation5_spill] sm:$0xff] %v2309_v12 }
 0x10c   : > { %v2311_v54 = vpop.permute.xlu1 %517 }
 0x10d   : > { %750 = vperm.xlu0 %1964, %v2109_v13  }
 0x110   : > { %v2313_v13 = vpop.permute.xlu0 %351  ;;  %v2315_v56 = vpop.permute.xlu1 %689 }
 0x111   : > { %830 = vperm.xlu0 %1964, %v1904_v39   ;;  %3177 = vst [vmem:[#allocation6_spill] sm:$0xff] %v2315_v56 }
 0x114   : > { %v2319_v59 = vpop.permute.xlu1 %316 }
 0x115   : > { %1968 = vset.pattern.permute.xlu0 %v3156_v10  ;;  %v2317_v57 = vpop.permute.xlu0 %385 }
 0x11a   : > { %v2323_v63 = vpop.permute.xlu0 %419 }
 0x133   : > { %v2321_v61 = vpop.permute.xlu1 %606 }
 0x137   : > { %v2325_v2 = vpop.permute.xlu1 %629 }
 0x138   : > { %v2327_v4 = vpop.permute.xlu0 %651 }
 0x139   : > { %3178 = vst [vmem:[#allocation7_spill] sm:$0xff] %v2327_v4 }
 0x13b   : > { %v2329_v5 = vpop.permute.xlu1 %318 }
 0x13d   : > { %v2331_v11 = vpop.permute.xlu0 %673 }
 0x13e   : > { %3179 = vst [vmem:[#allocation8_spill] sm:$0xff] %v2331_v11 }
 0x13f   : > { %v2333_v14 = vpop.permute.xlu1 %353 }
 0x141   : > { %v2335_v17 = vpop.permute.xlu0 %320 }
 0x143   : > { %v2337_v23 = vpop.permute.xlu1 %387 }
 0x145   : > { %v2339_v30 = vpop.permute.xlu0 %355 }
 0x147   : > { %v2341_v31 = vpop.permute.xlu1 %421 }
 0x149   : > { %v2345_v33 = vpop.permute.xlu0 %389 }
 0x14b   : > { %v2343_v32 = vpop.permute.xlu1 %610 }
 0x14d   : > { %v2349_v37 = vpop.permute.xlu0 %423 }
 0x14f   : > { %v2347_v36 = vpop.permute.xlu1 %631 }
 0x151   : > { %v2353_v10 = vpop.permute.xlu0 %608 }
 0x153   : > { %v2351_v39 = vpop.permute.xlu1 %653 }
 0x154   : > { %3180 = vst [vmem:[#allocation9_spill] sm:$0xff] %v2351_v39 }
 0x155   : > { %v2357_v8 = vpop.permute.xlu0 %633 }
 0x157   : > { %v2355_v1 = vpop.permute.xlu1 %675 }
 0x158   : > { %3181 = vst [vmem:[#allocation10_spill] sm:$0xff] %v2355_v1 }
 0x159   : > { %v2361_v20 = vpop.permute.xlu0 %655 }
 0x15a   : > { %3183 = vst [vmem:[#allocation12_spill] sm:$0xff] %v2361_v20 }
 0x15b   : > { %v2359_v6 = vpop.permute.xlu1 %765 }
 0x15c   : > { %3182 = vst [vmem:[#allocation11_spill] sm:$0xff] %v2359_v6 }
 0x15d   : > { %v2365_v9 = vpop.permute.xlu0 %769 }
 0x15e   : > { %3185 = vst [vmem:[#allocation14_spill] sm:$0xff] %v2365_v9 }
 0x15f   : > { %v2363_v40 = vpop.permute.xlu1 %767 }
 0x160   : > { %3184 = vst [vmem:[#allocation13_spill] sm:$0xff] %v2363_v40  ;;  %v2460_v40 = vld [vmem:[%s3153_s1 + $0x2c] sm:$0xf] }
 0x16a   : > { %v873_v12 = vpop.permute.xlu0 %872 }
 0x16b   : > { %v876_v6 = vmul.f32 %v873_v12, %v2209_v55  ;;  %v3186_v55 = vlaneseq }
 0x16c   : > { %v850_v11 = vpop.permute.xlu1 %849 }
 0x16d   : > { %v854_v56 = vmul.f32 %v850_v11, %v2215_v58  ;;  %v852_v50 = vmul.f32 %v850_v11, %v2160_v28  ;;  %v853_v1 = vmul.f32 %v850_v11, %v2201_v52  ;;  %v875_v58 = vmul.f32 %v873_v12, %v2156_v27 }
 0x16e   : > { %v3192_v11 = vmov 3  }
 0x16f   : > { %862 = vrot.lane.b32.xlu0 %v854_v56, %s2020_s19  ;;  %858 = vrot.lane.b32.xlu1 %v852_v50, %s2020_s19  ;;  %v877_v50 = vmul.f32 %v873_v12, %v2227_v62  ;;  %v3187_v62 = vmov 2  }
 0x171   : > { %v895_v20 = vpop.permute.xlu1 %894 }
 0x172   : > { %v897_v9 = vmul.f32 %v895_v20, %v2170_v34  ;;  %v899_v28 = vmul.f32 %v895_v20, %v2239_v3 }
 0x173   : > { %860 = vrot.lane.b32.xlu1 %v853_v1, %s2020_s19  ;;  %883 = vrot.lane.b32.xlu0 %v876_v6, %s2020_s19  ;;  %v898_v6 = vmul.f32 %v895_v20, %v2221_v60  ;;  %v1906_v20 = vld [vmem:[%s3153_s1 + $0x20] sm:$0xf]  ;;  %v2399_v60 = vand.u32 127, %v3186_v55  ;;  %v3194_v55 = vmov 1  }
 0x176   : > { %v917_v52 = vpop.permute.xlu1 %916 }
 0x177   : > { %903 = vrot.lane.b32.xlu0 %v897_v9, %s2020_s19  ;;  %881 = vrot.lane.b32.xlu1 %v875_v58, %s2020_s19  ;;  %v920_v1 = vmul.f32 %v917_v52, %v2233_v0  ;;  %v919_v27 = vmul.f32 %v917_v52, %v2179_v38  ;;  %v921_v34 = vmul.f32 %v917_v52, %v2247_v7  ;;  %v174_v38 = vadd.s32 128, %v2399_v60  ;;  %v2413_v7 = vld [vmem:[%s3153_s1 + $0x34] sm:$0xf]  ;;  %v2419_v9 = vld [vmem:[%s3153_s1 + $0x40] sm:$0xf] }
 0x178   : > { %v179_v0 = vand.u32 15, %v2399_v60  ;;  %v2434_v58 = vld [vmem:[%s3153_s1 + $0x30] sm:$0xf] }
 0x179   : > { %v186_v3 = vand.u32 15, %v174_v38 }
 0x17a   : > { %vm2421_vm1 = vcmp.ge.s32.totalorder %v179_v0, 1  ;;  %vm2479_vm5 = vcmp.le.s32.totalorder %v179_v0, 14  ;;  %v441_v0 = vsel %vm439_vm4, %v2301_v49, %v2307_v53  ;;  %v391_v53 = vsel %vm322_vm3, %v2317_v57, %v2337_v23 }
 0x17b   : > { %907 = vrot.lane.b32.xlu0 %v899_v28, %s2020_s19  ;;  %885 = vrot.lane.b32.xlu1 %v877_v50, %s2020_s19  ;;  %vm2425_vm2 = vcmp.ge.s32.totalorder %v186_v3, 1  ;;  %v223_v28 = vsel %vm2421_vm1, %v2117_v15, 0.0  ;;  %vm2483_vm6 = vcmp.le.s32.totalorder %v186_v3, 14 }
 0x17c   : > { %v224_v50 = vsel %vm2425_vm2, %v2124_v18, 0.0  ;;  %v234_v52 = vrot.slane %v223_v28, %v2148_v25 }
 0x17f   : > { %927 = vrot.lane.b32.xlu0 %v920_v1, %s2020_s19  ;;  %905 = vrot.lane.b32.xlu1 %v898_v6, %s2020_s19  ;;  %v238_v1 = vrot.slane %v224_v50, %v2148_v25  ;;  %v3193_v6 = vmov 0  }
 0x183   : > { %937 = vrot.lane.b32.xlu0 %v2117_v15, %s2021_s20  ;;  %925 = vrot.lane.b32.xlu1 %v919_v27, %s2020_s19  ;;  %v1907_v27 = vld [vmem:[%s3154_s2 + $0x4] sm:$0xf]  ;;  %v254_v15 = vrot.slane %v224_v50, %v2146_v24 }
 0x185   : > { %v256_v38 = vmul.f32 %v254_v15, %v2194_v46  ;;  %v282_v15 = vrot.slane %v223_v28, %v2173_v35 }
 0x187   : > { %941 = vrot.lane.b32.xlu0 %v2137_v21, %s2021_s20  ;;  %929 = vrot.lane.b32.xlu1 %v921_v34, %s2020_s19  ;;  %v1908_v21 = vld [vmem:[%s3153_s1 + $0x24] sm:$0xf]  ;;  %v250_v34 = vrot.slane %v223_v28, %v2146_v24 }
 0x189   : > { %v255_v60 = vmul.f32 %v250_v34, %v2194_v46 }
 0x18b   : > { %970 = vperm.xlu0 %1968, %v1906_v20   ;;  %939 = vrot.lane.b32.xlu1 %v2124_v18, %s2021_s20  ;;  %v239_v18 = vmul.f32 %v234_v52, %v2126_v19  ;;  %v266_v52 = vrot.slane %v223_v28, %v2162_v29 }
 0x18d   : > { %v241_v4 = vadd.f32 %v239_v18, %v2119_v16  ;;  %v271_v46 = vmul.f32 %v266_v52, %v2139_v22  ;;  %v286_v18 = vrot.slane %v224_v50, %v2173_v35 }
 0x18f   : > { %954 = vperm.xlu1 %1967, %v1906_v20   ;;  %1973 = vset.pattern.permute.xlu0 %v3187_v62 }
 0x190   : > { %1076 = vperm.xlu0 %1973, %v1908_v21  }
 0x193   : > { %1969 = vset.pattern.permute.xlu1 %v3187_v62 }
 0x194   : > { %986 = vperm.xlu1 %1969, %v1906_v20   ;;  %1454 = vperm.xlu0 %1973, %v2413_v7  }
 0x198   : > { %1970 = vset.pattern.permute.xlu1 %v3192_v11  ;;  %1703 = vperm.xlu0 %1973, %v2419_v9  }
 0x199   : > { %1002 = vperm.xlu1 %1970, %v1906_v20   ;;  %v240_v20 = vmul.f32 %v238_v1, %v2126_v19  ;;  %v270_v19 = vrot.slane %v224_v50, %v2162_v29  ;;  %v257_v1 = vadd.f32 %v255_v60, %v241_v4  ;;  %v323_v50 = vsel %vm322_vm3, %v2319_v59, %v2329_v5 }
 0x19a   : > { %v324_v60 = vsel %vm322_vm3, %v2329_v5, %v2335_v17  ;;  %v358_v59 = vsel %vm322_vm3, %v2333_v14, %v2339_v30 }
 0x19b   : > { %v242_v39 = vadd.f32 %v240_v20, %v2119_v16  ;;  %v272_v34 = vmul.f32 %v270_v19, %v2139_v22  ;;  %v1909_v16 = vld [vmem:[%s3153_s1 + $0x28] sm:$0xf]  ;;  %v273_v20 = vadd.f32 %v271_v46, %v257_v1  ;;  %v288_v22 = vmul.f32 %v286_v18, %v2150_v26 }
 0x19c   : > { %1375 = vperm.xlu0 %1973, %v2434_v58   ;;  %v357_v19 = vsel %vm322_vm3, %v2313_v13, %v2333_v14  ;;  %v392_v13 = vsel %vm322_vm3, %v2337_v23, %v2345_v33  ;;  %v425_v46 = vsel %vm322_vm3, %v2323_v63, %v2341_v31 }
 0x19d   : > { %1971 = vset.pattern.permute.xlu1 %v3193_v6 }
 0x19e   : > { %1044 = vperm.xlu1 %1971, %v1908_v21  }
 0x1a0   : > { %1988 = vset.pattern.permute.xlu0 %v3193_v6 }
 0x1a1   : > { %1035 = vperm.xlu0 %1988, %v1907_v27   ;;  %v258_v27 = vadd.f32 %v256_v38, %v242_v39  ;;  %v287_v39 = vmul.f32 %v282_v15, %v2150_v26  ;;  %v451_v38 = vpop.permute.xlu0 %450  ;;  %v440_v26 = vsel %vm439_vm4, %v2296_v47, %v2301_v49  ;;  %v445_v49 = vsel %vm2483_vm6, %v441_v0, 0.0 }
 0x1a2   : > { %1972 = vset.pattern.permute.xlu1 %v3194_v55  ;;  %v444_v47 = vsel %vm2479_vm5, %v440_v26, 0.0  ;;  %v492_v26 = vrot.slane %v445_v49, %v2162_v29 }
 0x1a3   : > { %1060 = vperm.xlu1 %1972, %v1908_v21   ;;  %v274_v4 = vadd.f32 %v272_v34, %v258_v27  ;;  %v289_v3 = vadd.f32 %v287_v39, %v273_v20  ;;  %v456_v1 = vrot.slane %v444_v47, %v2148_v25  ;;  %v460_v27 = vrot.slane %v445_v49, %v2148_v25 }
 0x1a4   : > { %v426_v34 = vsel %vm322_vm3, %v2341_v31, %v2349_v37  ;;  %v472_v33 = vrot.slane %v444_v47, %v2146_v24  ;;  %v488_v31 = vrot.slane %v444_v47, %v2162_v29 }
 0x1a5   : > { %1264 = vperm.xlu0 %1988, %v2460_v40   ;;  %v290_v52 = vadd.f32 %v288_v22, %v274_v4  ;;  %v327_v5 = vadd.f32 %v323_v50, %v289_v3  ;;  %v531_v57 = vpop.permute.xlu0 %530  ;;  %v461_v20 = vmul.f32 %v456_v1, %v451_v38  ;;  %v462_v23 = vmul.f32 %v460_v27, %v451_v38 }
 0x1a6   : > { %v476_v4 = vrot.slane %v445_v49, %v2146_v24  ;;  %v477_v38 = vmul.f32 %v472_v33, %v2184_v41 }
 0x1a7   : > { %1974 = vset.pattern.permute.xlu1 %v3192_v11  ;;  %v328_v17 = vadd.f32 %v324_v60, %v290_v52  ;;  %v361_v14 = vadd.f32 %v357_v19, %v327_v5  ;;  %v493_v52 = vmul.f32 %v488_v31, %v2188_v43  ;;  %v504_v19 = vrot.slane %v444_v47, %v2173_v35 }
 0x1a8   : > { %1092 = vperm.xlu1 %1974, %v1908_v21   ;;  %v478_v37 = vmul.f32 %v476_v4, %v2184_v41  ;;  %v508_v5 = vrot.slane %v445_v49, %v2173_v35  ;;  %v520_v41 = vsel %vm519_vm7, %v2298_v48, %v2305_v51 }
 0x1a9   : > { %1343 = vperm.xlu0 %1988, %v2434_v58   ;;  %v362_v30 = vadd.f32 %v358_v59, %v328_v17  ;;  %v395_v15 = vadd.f32 %v391_v53, %v361_v14  ;;  %v2527_v60 = vpop.permute.xlu0 %677  ;;  %v494_v59 = vmul.f32 %v492_v26, %v2188_v43  ;;  %v509_v47 = vmul.f32 %v504_v19, %v2186_v42 }
 0x1aa   : > { %v510_v43 = vmul.f32 %v508_v5, %v2186_v42  ;;  %v524_v49 = vsel %vm2421_vm1, %v520_v41, 0.0  ;;  %v613_v19 = vsel %vm612_vm8, %v2321_v61, %v2353_v10  ;;  %v636_v61 = vsel %vm612_vm8, %v2347_v36, %v2357_v8  ;;  %v3202_v8 = vld [vmem:[#allocation5_spill] sm:$0xff] }
 0x1ab   : > { %v396_v18 = vadd.f32 %v392_v13, %v362_v30  ;;  %v429_v39 = vadd.f32 %v425_v46, %v395_v15  ;;  %v536_v1 = vrot.slane %v524_v49, %v2148_v25  ;;  %v552_v42 = vrot.slane %v524_v49, %v2146_v24 }
 0x1ac   : > { %1975 = vset.pattern.permute.xlu1 %v3193_v6 }
 0x1ad   : > { %1111 = vperm.xlu1 %1975, %v1909_v16   ;;  %v430_v22 = vadd.f32 %v426_v34, %v396_v18  ;;  %v463_v50 = vadd.f32 %v461_v20, %v429_v39  ;;  %v2538_v17 = vpop.permute.xlu0 %702  ;;  %v541_v46 = vmul.f32 %v536_v1, %v531_v57  ;;  %v568_v20 = vrot.slane %v524_v49, %v2162_v29 }
 0x1ae   : > { %v557_v4 = vmul.f32 %v552_v42, %v2190_v44 }
 0x1af   : > { %v464_v63 = vadd.f32 %v462_v23, %v430_v22  ;;  %v479_v0 = vadd.f32 %v477_v38, %v463_v50 }
 0x1b1   : > { %1976 = vset.pattern.permute.xlu1 %v3194_v55  ;;  %v480_v3 = vadd.f32 %v478_v37, %v464_v63  ;;  %v495_v53 = vadd.f32 %v493_v52, %v479_v0  ;;  %v584_v63 = vrot.slane %v524_v49, %v2173_v35  ;;  %v573_v37 = vmul.f32 %v568_v20, %v2192_v45  ;;  %v3206_v20 = vld [vmem:[#allocation8_spill] sm:$0xff] }
 0x1b2   : > { %1145 = vperm.xlu1 %1976, %v1909_v16  }
 0x1b3   : > { %v496_v13 = vadd.f32 %v494_v59, %v480_v3  ;;  %v511_v30 = vadd.f32 %v509_v47, %v495_v53  ;;  %v2582_v59 = vpop.permute.xlu1 %798  ;;  %v3200_v47 = vld [vmem:[#allocation7_spill] sm:$0xff] }
 0x1b5   : > { %v512_v48 = vadd.f32 %v510_v43, %v496_v13  ;;  %v543_v15 = vadd.f32 %v541_v46, %v511_v30  ;;  %v3199_v43 = vld [vmem:[#allocation9_spill] sm:$0xff] }
 0x1b6   : > { %1977 = vset.pattern.permute.xlu1 %v3187_v62  ;;  %v657_v49 = vsel %vm612_vm8, %v3200_v47, %v3199_v43  ;;  %v3211_v47 = vld [vmem:[#allocation14_spill] sm:$0xff] }
 0x1b7   : > { %1179 = vperm.xlu1 %1977, %v1909_v16   ;;  %v559_v22 = vadd.f32 %v557_v4, %v543_v15 }
 0x1bb   : > { %1978 = vset.pattern.permute.xlu1 %v3192_v11 }
 0x1bc   : > { %1213 = vperm.xlu1 %1978, %v1909_v16   ;;  %v521_v16 = vsel %vm519_vm7, %v2305_v51, %v2311_v54  ;;  %v2557_v54 = vpop.permute.xlu0 %782 }
 0x1bd   : > { %v525_v14 = vsel %vm2425_vm2, %v521_v16, 0.0 }
 0x1be   : > { %v540_v51 = vrot.slane %v525_v14, %v2148_v25  ;;  %v556_v27 = vrot.slane %v525_v14, %v2146_v24  ;;  %v572_v33 = vrot.slane %v525_v14, %v2162_v29 }
 0x1c0   : > { %1979 = vset.pattern.permute.xlu1 %v3194_v55  ;;  %v542_v34 = vmul.f32 %v540_v51, %v531_v57  ;;  %v558_v23 = vmul.f32 %v556_v27, %v2190_v44  ;;  %v579_v39 = vpop.permute.xlu0 %578  ;;  %v588_v57 = vrot.slane %v525_v14, %v2173_v35  ;;  %v574_v31 = vmul.f32 %v572_v33, %v2192_v45  ;;  %v3201_v14 = vld [vmem:[#allocation12_spill] sm:$0xff] }
 0x1c1   : > { %1280 = vperm.xlu1 %1979, %v2460_v40   ;;  %v589_v26 = vmul.f32 %v584_v63, %v579_v39  ;;  %v575_v44 = vadd.f32 %v573_v37, %v559_v22  ;;  %v614_v45 = vsel %vm612_vm8, %v2353_v10, %v2343_v32  ;;  %v2594_v32 = vpop.permute.xlu1 %814 }
 0x1c2   : > { %v544_v18 = vadd.f32 %v542_v34, %v512_v48  ;;  %v590_v38 = vmul.f32 %v588_v57, %v579_v39  ;;  %v3204_v48 = vld [vmem:[#allocation6_spill] sm:$0xff] }
 0x1c3   : > { %v591_v3 = vadd.f32 %v589_v26, %v575_v44  ;;  %v693_v1 = vsel %vm691_vm9, %v3202_v8, %v3204_v48 }
 0x1c4   : > { %v560_v50 = vadd.f32 %v558_v23, %v544_v18  ;;  %v2584_v16 = vpop.permute.xlu0 %750  ;;  %v697_v15 = vsel %vm2483_vm6, %v693_v1, 0.0  ;;  %v3205_v18 = vld [vmem:[#allocation10_spill] sm:$0xff] }
 0x1c5   : > { %1980 = vset.pattern.permute.xlu1 %v3187_v62  ;;  %v617_v5 = vadd.f32 %v613_v19, %v591_v3  ;;  %v679_v23 = vsel %vm612_vm8, %v3206_v20, %v3205_v18  ;;  %v680_v33 = vsel %vm612_vm8, %v3205_v18, %v2527_v60  ;;  %v712_v39 = vrot.slane %v697_v15, %v2148_v25  ;;  %v2667_v18 = vld [vmem:[%s3153_s1 + $0x38] sm:$0xf] }
 0x1c6   : > { %1296 = vperm.xlu1 %1980, %v2460_v40   ;;  %v576_v0 = vadd.f32 %v574_v31, %v560_v50  ;;  %v728_v57 = vrot.slane %v697_v15, %v2146_v24  ;;  %v744_v19 = vrot.slane %v697_v15, %v2162_v29  ;;  %v760_v48 = vrot.slane %v697_v15, %v2173_v35 }
 0x1c7   : > { %v714_v37 = vmul.f32 %v712_v39, %v2538_v17 }
 0x1c8   : > { %v592_v52 = vadd.f32 %v590_v38, %v576_v0  ;;  %v2596_v13 = vpop.permute.xlu0 %830  ;;  %v3207_v0 = vld [vmem:[#allocation2_spill] sm:$0xff]  ;;  %v762_v20 = vmul.f32 %v760_v48, %v2584_v16 }
 0x1ca   : > { %1981 = vset.pattern.permute.xlu1 %v3193_v6  ;;  %v618_v41 = vadd.f32 %v614_v45, %v592_v52  ;;  %v730_v52 = vmul.f32 %v728_v57, %v3207_v0 }
 0x1cb   : > { %1410 = vperm.xlu1 %1981, %v2413_v7  }
 0x1cc   : > { %v640_v10 = vadd.f32 %v636_v61, %v618_v41 }
 0x1cf   : > { %1982 = vset.pattern.permute.xlu1 %v3194_v55 }
 0x1d0   : > { %1432 = vperm.xlu1 %1982, %v2413_v7  }
 0x1d4   : > { %1983 = vset.pattern.permute.xlu1 %v3192_v11 }
 0x1d5   : > { %1476 = vperm.xlu1 %1983, %v2413_v7   ;;  %v635_v7 = vsel %vm612_vm8, %v2325_v2, %v2347_v36  ;;  %v658_v2 = vsel %vm612_vm8, %v3199_v43, %v3201_v14  ;;  %v3203_v36 = vld [vmem:[#allocation4_spill] sm:$0xff] }
 0x1d6   : > { %v639_v53 = vadd.f32 %v635_v7, %v617_v5  ;;  %v692_v30 = vsel %vm691_vm9, %v3203_v36, %v3202_v8  ;;  %v662_v42 = vadd.f32 %v658_v2, %v640_v10  ;;  %v3208_v7 = vld [vmem:[#allocation3_spill] sm:$0xff] }
 0x1d7   : > { %v696_v34 = vsel %vm2479_vm5, %v692_v30, 0.0  ;;  %v746_v61 = vmul.f32 %v744_v19, %v3208_v7  ;;  %v3210_v10 = vld [vmem:[#allocation11_spill] sm:$0xff] }
 0x1d8   : > { %v661_v51 = vadd.f32 %v657_v49, %v639_v53  ;;  %v708_v4 = vrot.slane %v696_v34, %v2148_v25  ;;  %v684_v50 = vadd.f32 %v680_v33, %v662_v42  ;;  %v724_v63 = vrot.slane %v696_v34, %v2146_v24  ;;  %v3209_v53 = vld [vmem:[#allocation13_spill] sm:$0xff] }
 0x1d9   : > { %1984 = vset.pattern.permute.xlu1 %v3193_v6  ;;  %v772_v43 = vsel %vm771_vm10, %v3210_v10, %v3209_v53  ;;  %v773_v49 = vsel %vm771_vm10, %v3209_v53, %v3211_v47  ;;  %v756_v30 = vrot.slane %v696_v34, %v2173_v35 }
 0x1da   : > { %1659 = vperm.xlu1 %1984, %v2419_v9   ;;  %v683_v22 = vadd.f32 %v679_v23, %v661_v51  ;;  %v713_v31 = vmul.f32 %v708_v4, %v2538_v17  ;;  %v716_v44 = vadd.f32 %v714_v37, %v684_v50  ;;  %v729_v3 = vmul.f32 %v724_v63, %v3207_v0 }
 0x1db   : > { %v776_v1 = vsel %vm2421_vm1, %v772_v43, 0.0  ;;  %v777_v51 = vsel %vm2425_vm2, %v773_v49, 0.0 }
 0x1dc   : > { %v715_v38 = vadd.f32 %v713_v31, %v683_v22  ;;  %v732_v41 = vadd.f32 %v730_v52, %v716_v44  ;;  %v792_v15 = vrot.slane %v777_v51, %v2148_v25  ;;  %v804_v57 = vrot.slane %v776_v1, %v2146_v24 }
 0x1dd   : > { %v836_v53 = vrot.slane %v776_v1, %v2173_v35 }
 0x1de   : > { %1985 = vset.pattern.permute.xlu1 %v3194_v55  ;;  %v731_v5 = vadd.f32 %v729_v3, %v715_v38  ;;  %v748_v36 = vadd.f32 %v746_v61, %v732_v41  ;;  %v794_v22 = vmul.f32 %v792_v15, %v2557_v54  ;;  %v809_v38 = vmul.f32 %v804_v57, %v2582_v59 }
 0x1df   : > { %1681 = vperm.xlu1 %1985, %v2419_v9   ;;  %v820_v3 = vrot.slane %v776_v1, %v2162_v29  ;;  %v841_v43 = vmul.f32 %v836_v53, %v2596_v13 }
 0x1e0   : > { %v764_v4 = vadd.f32 %v762_v20, %v748_v36 }
 0x1e1   : > { %v2612_v27 = vpop.permute.xlu1 %858  ;;  %v2614_v46 = vpop.permute.xlu0 %862 }
 0x1e2   : > { %v796_v37 = vadd.f32 %v794_v22, %v764_v4 }
 0x1e3   : > { %1986 = vset.pattern.permute.xlu1 %v3192_v11 }
 0x1e4   : > { %1725 = vperm.xlu1 %1986, %v2419_v9   ;;  %v740_v9 = vrot.slane %v696_v34, %v2162_v29  ;;  %v788_v34 = vrot.slane %v776_v1, %v2148_v25 }
 0x1e5   : > { %v2634_v26 = vpop.permute.xlu1 %860  ;;  %v2636_v60 = vpop.permute.xlu0 %883 }
 0x1e6   : > { %v745_v14 = vmul.f32 %v740_v9, %v3208_v7  ;;  %v793_v39 = vmul.f32 %v788_v34, %v2557_v54  ;;  %v824_v54 = vrot.slane %v777_v51, %v2162_v29  ;;  %v865_v49 = vsel %vm864_vm11, %v2612_v27, %v2634_v26 }
 0x1e8   : > { %1987 = vset.pattern.permute.xlu1 %v3194_v55  ;;  %v747_v8 = vadd.f32 %v745_v14, %v731_v5  ;;  %v825_v5 = vmul.f32 %v820_v3, %v2594_v32  ;;  %v826_v41 = vmul.f32 %v824_v54, %v2594_v32  ;;  %v866_v32 = vsel %vm864_vm11, %v2634_v26, %v2614_v46 }
 0x1e9   : > { %v2643_v45 = vpop.permute.xlu1 %881  ;;  %1359 = vperm.xlu1 %1987, %v2434_v58   ;;  %v2646_v17 = vpop.permute.xlu0 %903 }
 0x1ea   : > { %v887_v1 = vsel %vm864_vm11, %v2643_v45, %v2636_v60 }
 0x1ed   : > { %v886_v2 = vpop.permute.xlu1 %885  ;;  %1989 = vset.pattern.permute.xlu1 %v3192_v11  ;;  %v908_v42 = vpop.permute.xlu0 %907 }
 0x1ee   : > { %1391 = vperm.xlu1 %1989, %v2434_v58   ;;  %v761_v58 = vmul.f32 %v756_v30, %v2584_v16  ;;  %v808_v16 = vrot.slane %v777_v51, %v2146_v24 }
 0x1f0   : > { %v763_v33 = vadd.f32 %v761_v58, %v747_v8  ;;  %v810_v44 = vmul.f32 %v808_v16, %v2582_v59  ;;  %v840_v59 = vrot.slane %v777_v51, %v2173_v35 }
 0x1f1   : > { %v906_v23 = vpop.permute.xlu1 %905  ;;  %v928_v63 = vpop.permute.xlu0 %927 }
 0x1f2   : > { %1990 = vset.pattern.permute.xlu1 %v3193_v6  ;;  %v795_v31 = vadd.f32 %v793_v39, %v763_v33  ;;  %v812_v52 = vadd.f32 %v810_v44, %v796_v37  ;;  %v842_v47 = vmul.f32 %v840_v59, %v2596_v13  ;;  %v888_v13 = vsel %vm864_vm11, %v2636_v60, %v886_v2 }
 0x1f3   : > { %1513 = vperm.xlu1 %1990, %v2667_v18   ;;  %v909_v58 = vsel %vm864_vm11, %v2646_v17, %v906_v23  ;;  %v910_v46 = vsel %vm864_vm11, %v906_v23, %v908_v42 }
 0x1f4   : > { %v811_v9 = vadd.f32 %v809_v38, %v795_v31  ;;  %v828_v61 = vadd.f32 %v826_v41, %v812_v52 }
 0x1f5   : > { %v926_v50 = vpop.permute.xlu1 %925  ;;  %v938_v19 = vpop.permute.xlu0 %937 }
 0x1f6   : > { %v827_v7 = vadd.f32 %v825_v5, %v811_v9  ;;  %v844_v36 = vadd.f32 %v842_v47, %v828_v61  ;;  %v931_v45 = vsel %vm864_vm11, %v926_v50, %v928_v63 }
 0x1f7   : > { %1991 = vset.pattern.permute.xlu1 %v3194_v55 }
 0x1f8   : > { %1529 = vperm.xlu1 %1991, %v2667_v18   ;;  %v843_v8 = vadd.f32 %v841_v43, %v827_v7  ;;  %v870_v27 = vadd.f32 %v866_v32, %v844_v36  ;;  %v2729_v36 = vld [vmem:[%s3153_s1 + $0x44] sm:$0xf] }
 0x1f9   : > { %v930_v0 = vpop.permute.xlu1 %929  ;;  %v942_v14 = vpop.permute.xlu0 %941 }
 0x1fa   : > { %v869_v51 = vadd.f32 %v865_v49, %v843_v8  ;;  %v892_v15 = vadd.f32 %v888_v13, %v870_v27  ;;  %v932_v33 = vsel %vm864_vm11, %v928_v63, %v930_v0 }
 0x1fc   : > { %1992 = vset.pattern.permute.xlu1 %v3187_v62  ;;  %v891_v34 = vadd.f32 %v887_v1, %v869_v51  ;;  %v914_v2 = vadd.f32 %v910_v46, %v892_v15 }
 0x1fd   : > { %v940_v10 = vpop.permute.xlu1 %939 }
 0x1fe   : > { %v944_v30 = vsel %vm943_vm12, %v938_v19, %v940_v10  ;;  %v945_v48 = vsel %vm943_vm12, %v940_v10, %v942_v14  ;;  %v913_v60 = vadd.f32 %v909_v58, %v891_v34  ;;  %v936_v23 = vadd.f32 %v932_v33, %v914_v2 }
 0x1ff   : > { %v948_v26 = vsel %vm2479_vm5, %v944_v30, 0.0  ;;  %v949_v20 = vsel %vm2483_vm6, %v945_v48, 0.0  ;;  %v1914_v48 = vld [vmem:[%s3153_s1 + $0x3c] sm:$0xf] }
 0x200   : > { %v960_v4 = vrot.slane %v948_v26, %v2148_v25  ;;  %v964_v17 = vrot.slane %v949_v20, %v2148_v25  ;;  %v935_v42 = vadd.f32 %v931_v45, %v913_v60  ;;  %v976_v31 = vrot.slane %v948_v26, %v2146_v24 }
 0x201   : > { %v980_v37 = vrot.slane %v949_v20, %v2146_v24  ;;  %v992_v3 = vrot.slane %v948_v26, %v2162_v29  ;;  %v996_v54 = vrot.slane %v949_v20, %v2162_v29  ;;  %v1008_v41 = vrot.slane %v948_v26, %v2173_v35 }
 0x202   : > { %v1012_v7 = vrot.slane %v949_v20, %v2173_v35 }
 0x206   : > { %v971_v16 = vpop.permute.xlu0 %970 }
 0x207   : > { %v981_v44 = vmul.f32 %v976_v31, %v971_v16  ;;  %v982_v63 = vmul.f32 %v980_v37, %v971_v16 }
 0x20a   : > { %v955_v39 = vpop.permute.xlu1 %954 }
 0x20b   : > { %v965_v22 = vmul.f32 %v960_v4, %v955_v39  ;;  %v966_v57 = vmul.f32 %v964_v17, %v955_v39 }
 0x20d   : > { %v967_v38 = vadd.f32 %v965_v22, %v935_v42  ;;  %v968_v50 = vadd.f32 %v966_v57, %v936_v23 }
 0x20f   : > { %v987_v0 = vpop.permute.xlu1 %986  ;;  %v983_v9 = vadd.f32 %v981_v44, %v967_v38  ;;  %v984_v52 = vadd.f32 %v982_v63, %v968_v50 }
 0x210   : > { %v997_v19 = vmul.f32 %v992_v3, %v987_v0  ;;  %v998_v5 = vmul.f32 %v996_v54, %v987_v0 }
 0x212   : > { %v999_v53 = vadd.f32 %v997_v19, %v983_v9  ;;  %v1000_v59 = vadd.f32 %v998_v5, %v984_v52 }
 0x214   : > { %v1003_v61 = vpop.permute.xlu1 %1002 }
 0x215   : > { %v1013_v10 = vmul.f32 %v1008_v41, %v1003_v61  ;;  %v1014_v43 = vmul.f32 %v1012_v7, %v1003_v61 }
 0x217   : > { %v1016_v47 = vadd.f32 %v1014_v43, %v1000_v59  ;;  %v1015_v49 = vadd.f32 %v1013_v10, %v999_v53 }
 0x219   : > { %v1018_v32 = vmax.f32 %v1016_v47, 0.0  ;;  %v1017_v14 = vmax.f32 %v1015_v49, 0.0  ;;  %v2724_v8 = vpop.permute.xlu1 %1044 }
 0x21b   : > { %1023 = vrot.lane.b32.xlu1 %v1018_v32, %s2010_s22  ;;  %1021 = vrot.lane.b32.xlu0 %v1017_v14, %s2010_s22 }
 0x21e   : > { %v2733_v30 = vpop.permute.xlu1 %1060 }
 0x21f   : > { %1762 = vperm.xlu0 %1988, %v2729_v36   ;;  %1545 = vperm.xlu1 %1992, %v2667_v18  }
 0x223   : > { %1993 = vset.pattern.permute.xlu1 %v3193_v6  ;;  %1996 = vset.pattern.permute.xlu0 %v3194_v55  ;;  %v2740_v1 = vpop.permute.xlu1 %1092 }
 0x224   : > { %1592 = vperm.xlu1 %1993, %v1914_v48   ;;  %1608 = vperm.xlu0 %1996, %v1914_v48  }
 0x228   : > { %1994 = vset.pattern.permute.xlu1 %v3187_v62  ;;  %1778 = vperm.xlu0 %1996, %v2729_v36   ;;  %v1112_v13 = vpop.permute.xlu1 %1111 }
 0x229   : > { %1624 = vperm.xlu1 %1994, %v1914_v48  }
 0x22c   : > { %1997 = vset.pattern.permute.xlu0 %v3192_v11 }
 0x22d   : > { %1995 = vset.pattern.permute.xlu1 %v3192_v11  ;;  %1312 = vperm.xlu0 %1997, %v2460_v40   ;;  %v1146_v6 = vpop.permute.xlu1 %1145  ;;  %v2764_v40 = vpop.permute.xlu0 %1076 }
 0x22e   : > { %1640 = vperm.xlu1 %1995, %v1914_v48  }
 0x231   : > { %v2768_v34 = vpop.permute.xlu0 %1454 }
 0x232   : > { %1998 = vset.pattern.permute.xlu1 %v3187_v62  ;;  %v2748_v55 = vpop.permute.xlu1 %1179 }
 0x235   : > { %v2772_v45 = vpop.permute.xlu0 %1703 }
 0x237   : > { %v2750_v51 = vpop.permute.xlu1 %1213 }
 0x239   : > { %v2776_v60 = vpop.permute.xlu0 %1375 }
 0x23c   : > { %v2752_v27 = vpop.permute.xlu1 %1280 }
 0x23d   : > { %v2780_v4 = vpop.permute.xlu0 %1035 }
 0x241   : > { %v2754_v58 = vpop.permute.xlu1 %1296  ;;  %v2784_v39 = vpop.permute.xlu0 %1264 }
 0x245   : > { %v2788_v23 = vpop.permute.xlu0 %1343 }
 0x246   : > { %v2756_v46 = vpop.permute.xlu1 %1410 }
 0x24b   : > { %v2758_v26 = vpop.permute.xlu1 %1432 }
 0x250   : > { %v2760_v20 = vpop.permute.xlu1 %1476 }
 0x255   : > { %v2762_v11 = vpop.permute.xlu1 %1659 }
 0x25a   : > { %v2766_v62 = vpop.permute.xlu1 %1681 }
 0x25f   : > { %v2770_v15 = vpop.permute.xlu1 %1725 }
 0x264   : > { %v2774_v33 = vpop.permute.xlu1 %1359 }
 0x269   : > { %v2778_v2 = vpop.permute.xlu1 %1391 }
 0x26e   : > { %v2782_v17 = vpop.permute.xlu1 %1513 }
 0x273   : > { %v2786_v42 = vpop.permute.xlu1 %1529 }
 0x28d   : > { %v1024_v22 = vpop.permute.xlu1 %1023  ;;  %v1022_v57 = vpop.permute.xlu0 %1021 }
 0x28e   : > { %v2791_v16 = vsel %vm210_vm0, %v1022_v57, %v1024_v22  ;;  %v2794_v31 = vsel %vm210_vm0, 0.0, %v1022_v57  ;;  %v1030_v37 = vsel %vm210_vm0, %v1024_v22, 0.0 }
 0x28f   : > { %1248 = vrot.lane.b32.xlu1 %v2794_v31, %s2014_s6  ;;  %1250 = vrot.lane.b32.xlu0 %v2791_v16, %s2014_s6  ;;  %v1117_v38 = vrot.slane %v2794_v31, %v2148_v25  ;;  %v1125_v50 = vrot.slane %v1030_v37, %v2148_v25  ;;  %v1151_v54 = vrot.slane %v2794_v31, %v2146_v24 }
 0x290   : > { %v1159_v52 = vrot.slane %v1030_v37, %v2146_v24  ;;  %v1121_v19 = vrot.slane %v2791_v16, %v2148_v25  ;;  %v1185_v7 = vrot.slane %v2794_v31, %v2162_v29  ;;  %v2843_v61 = vrot.slane %v2791_v16, %v2146_v24 }
 0x291   : > { %v2812_v44 = vmul.f32 %v2762_v11, %v1117_v38  ;;  %v2815_v63 = vmul.f32 %v2762_v11, %v1125_v50  ;;  %v1126_v0 = vmul.f32 %v1117_v38, %v1112_v13  ;;  %v1128_v3 = vmul.f32 %v1125_v50, %v1112_v13 }
 0x292   : > { %v1160_v9 = vmul.f32 %v1151_v54, %v1146_v6  ;;  %v1162_v5 = vmul.f32 %v1159_v52, %v1146_v6  ;;  %v1127_v41 = vmul.f32 %v1121_v19, %v1112_v13  ;;  %v1194_v53 = vmul.f32 %v1185_v7, %v2748_v55 }
 0x293   : > { %1252 = vrot.lane.b32.xlu1 %v1030_v37, %s2014_s6  ;;  %1329 = vrot.lane.b32.xlu0 %v2791_v16, %s2015_s7  ;;  %v1161_v59 = vmul.f32 %v2843_v61, %v1146_v6  ;;  %v1193_v10 = vrot.slane %v1030_v37, %v2162_v29  ;;  %v2852_v43 = vrot.slane %v2791_v16, %v2162_v29 }
 0x294   : > { %v1219_v32 = vrot.slane %v2794_v31, %v2173_v35  ;;  %v1223_v14 = vrot.slane %v2791_v16, %v2173_v35  ;;  %v1227_v6 = vrot.slane %v1030_v37, %v2173_v35  ;;  %v1414_v22 = vmul.f32 %v2756_v46, %v1121_v19 }
 0x295   : > { %v1196_v47 = vmul.f32 %v1193_v10, %v2748_v55  ;;  %v1195_v49 = vmul.f32 %v2852_v43, %v2748_v55  ;;  %v1413_v57 = vmul.f32 %v2756_v46, %v1117_v38  ;;  %v1458_v38 = vmul.f32 %v2768_v34, %v2852_v43 }
 0x296   : > { %v1228_v48 = vmul.f32 %v1219_v32, %v2750_v51  ;;  %v1229_v13 = vmul.f32 %v1223_v14, %v2750_v51  ;;  %v1230_v55 = vmul.f32 %v1227_v6, %v2750_v51  ;;  %v1436_v51 = vmul.f32 %v2758_v26, %v2843_v61 }
 0x297   : > { %1327 = vrot.lane.b32.xlu1 %v2794_v31, %s2015_s7  ;;  %1497 = vrot.lane.b32.xlu0 %v2794_v31, %s2016_s8 }
 0x29b   : > { %1331 = vrot.lane.b32.xlu1 %v1030_v37, %s2015_s7  ;;  %1501 = vrot.lane.b32.xlu0 %v1030_v37, %s2016_s8  ;;  %s170_s7 = scalar_lea.vmem %s3155_s3, %s1919_s18 }
 0x29f   : > { %1499 = vrot.lane.b32.xlu1 %v2791_v16, %s2016_s8  ;;  %1578 = vrot.lane.b32.xlu0 %v2791_v16, %s2019_s11 }
 0x2a3   : > { %1576 = vrot.lane.b32.xlu1 %v2794_v31, %s2019_s11  ;;  %1750 = vrot.lane.b32.xlu0 %v1030_v37, %s2021_s20 }
 0x2a7   : > { %1580 = vrot.lane.b32.xlu1 %v1030_v37, %s2019_s11  ;;  %1132 = vrot.lane.b32.xlu0 %v1126_v0, %s2017_s9  ;;  %v1435_v0 = vmul.f32 %v2758_v26, %v1151_v54  ;;  %v1415_v37 = vmul.f32 %v2756_v46, %v1125_v50  ;;  %v1480_v46 = vmul.f32 %v2760_v20, %v1223_v14 }
 0x2a8   : > { %v1459_v50 = vmul.f32 %v2768_v34, %v1193_v10 }
 0x2ab   : > { %1746 = vrot.lane.b32.xlu1 %v2794_v31, %s2021_s20  ;;  %1136 = vrot.lane.b32.xlu0 %v1128_v3, %s2017_s9  ;;  %v1437_v3 = vmul.f32 %v2758_v26, %v1159_v52  ;;  %v1479_v26 = vmul.f32 %v2760_v20, %v1219_v32 }
 0x2af   : > { %1748 = vrot.lane.b32.xlu1 %v2791_v16, %s2021_s20  ;;  %1166 = vrot.lane.b32.xlu0 %v1160_v9, %s2017_s9  ;;  %v1457_v9 = vmul.f32 %v2768_v34, %v1185_v7  ;;  %v1708_v34 = vmul.f32 %v2772_v45, %v1193_v10  ;;  %v1707_v10 = vmul.f32 %v2772_v45, %v2852_v43 }
 0x2b3   : > { %1170 = vrot.lane.b32.xlu0 %v1162_v5, %s2017_s9  ;;  %1134 = vrot.lane.b32.xlu1 %v1127_v41, %s2017_s9  ;;  %v1663_v5 = vmul.f32 %v2762_v11, %v1121_v19  ;;  %v1684_v41 = vmul.f32 %v2766_v62, %v1151_v54  ;;  %v1706_v11 = vmul.f32 %v2772_v45, %v1185_v7  ;;  %v2912_v54 = vpop.permute.xlu1 %1545 }
 0x2b4   : > { %v1729_v19 = vmul.f32 %v2770_v15, %v1223_v14 }
 0x2b7   : > { %1200 = vrot.lane.b32.xlu0 %v1194_v53, %s2017_s9  ;;  %1168 = vrot.lane.b32.xlu1 %v1161_v59, %s2017_s9  ;;  %v1481_v53 = vmul.f32 %v2760_v20, %v1227_v6  ;;  %v1686_v59 = vmul.f32 %v2766_v62, %v1159_v52  ;;  %v1728_v20 = vmul.f32 %v2770_v15, %v1219_v32  ;;  %v2914_v52 = vpop.permute.xlu0 %1762 }
 0x2b8   : > { %3212 = vst [vmem:[#allocation9_spill] sm:$0xff] %v2914_v52 }
 0x2bb   : > { %1204 = vrot.lane.b32.xlu0 %v1196_v47, %s2017_s9  ;;  %1202 = vrot.lane.b32.xlu1 %v1195_v49, %s2017_s9  ;;  %v2926_v7 = vpop.permute.xlu0 %1608 }
 0x2bf   : > { %1234 = vrot.lane.b32.xlu0 %v1228_v48, %s2017_s9  ;;  %1236 = vrot.lane.b32.xlu1 %v1229_v13, %s2017_s9 }
 0x2c3   : > { %1238 = vrot.lane.b32.xlu0 %v1230_v55, %s2017_s9  ;;  %1421 = vrot.lane.b32.xlu1 %v1414_v22, %s2018_s10 }
 0x2c7   : > { %1419 = vrot.lane.b32.xlu0 %v1413_v57, %s2018_s10  ;;  %1441 = vrot.lane.b32.xlu1 %v1435_v0, %s2018_s10 }
 0x2cb   : > { %1423 = vrot.lane.b32.xlu0 %v1415_v37, %s2018_s10  ;;  %1445 = vrot.lane.b32.xlu1 %v1437_v3, %s2018_s10 }
 0x2cf   : > { %1443 = vrot.lane.b32.xlu0 %v1436_v51, %s2018_s10  ;;  %1465 = vrot.lane.b32.xlu1 %v1458_v38, %s2018_s10 }
 0x2d3   : > { %1463 = vrot.lane.b32.xlu0 %v1457_v9, %s2018_s10  ;;  %1487 = vrot.lane.b32.xlu1 %v1480_v46, %s2018_s10  ;;  %v1039_v9 = vsel %vm2425_vm2, %v2791_v16, 0.0 }
 0x2d7   : > { %1467 = vrot.lane.b32.xlu0 %v1459_v50, %s2018_s10  ;;  %1670 = vrot.lane.b32.xlu1 %v1663_v5, %s2020_s19 }
 0x2db   : > { %1485 = vrot.lane.b32.xlu0 %v1479_v26, %s2018_s10  ;;  %1690 = vrot.lane.b32.xlu1 %v1684_v41, %s2020_s19  ;;  %v1054_v41 = vrot.slane %v1039_v9, %v2148_v25 }
 0x2df   : > { %1489 = vrot.lane.b32.xlu0 %v1481_v53, %s2018_s10  ;;  %1694 = vrot.lane.b32.xlu1 %v1686_v59, %s2020_s19 }
 0x2e3   : > { %1561 = vperm.xlu0 %1997, %v2667_v18   ;;  %1712 = vrot.lane.b32.xlu1 %v1706_v11, %s2020_s19  ;;  %v1685_v18 = vmul.f32 %v2766_v62, %v2843_v61  ;;  %v2935_v61 = vpop.permute.xlu0 %1778 }
 0x2e4   : > { %3213 = vst [vmem:[#allocation7_spill] sm:$0xff] %v2935_v61 }
 0x2e7   : > { %1668 = vrot.lane.b32.xlu0 %v2812_v44, %s2020_s19  ;;  %1716 = vrot.lane.b32.xlu1 %v1708_v34, %s2020_s19  ;;  %v2924_v44 = vpop.permute.xlu1 %1592  ;;  %v2939_v49 = vpop.permute.xlu0 %1312 }
 0x2eb   : > { %1672 = vrot.lane.b32.xlu0 %v2815_v63, %s2020_s19  ;;  %1734 = vrot.lane.b32.xlu1 %v1728_v20, %s2020_s19  ;;  %v1730_v63 = vmul.f32 %v2770_v15, %v1227_v6  ;;  %v2933_v62 = vpop.permute.xlu1 %1624 }
 0x2ef   : > { %1692 = vrot.lane.b32.xlu0 %v1685_v18, %s2020_s19  ;;  %1736 = vrot.lane.b32.xlu1 %v1729_v19, %s2020_s19  ;;  %v1641_v47 = vpop.permute.xlu1 %1640  ;;  %v1056_v19 = vmul.f32 %v1054_v41, %v2724_v8 }
 0x2f3   : > { %1714 = vrot.lane.b32.xlu0 %v1707_v10, %s2020_s19  ;;  %1794 = vperm.xlu1 %1998, %v2729_v36  }
 0x2f7   : > { %1738 = vrot.lane.b32.xlu0 %v1730_v63, %s2020_s19 }
 0x2fb   : > { %1810 = vperm.xlu0 %1997, %v2729_v36   ;;  %v1038_v36 = vsel %vm2421_vm1, %v2794_v31, 0.0 }
 0x2fc   : > { %v1050_v51 = vrot.slane %v1038_v36, %v2148_v25  ;;  %v1066_v34 = vrot.slane %v1038_v36, %v2146_v24 }
 0x2fe   : > { %v1055_v26 = vmul.f32 %v1050_v51, %v2724_v8  ;;  %v1086_v8 = vrot.slane %v1039_v9, %v2162_v29 }
 0x300   : > { %v1057_v18 = vadd.f32 %v1055_v26, %v2780_v4 }
 0x301   : > { %v1249_v32 = vpop.permute.xlu1 %1248  ;;  %v1251_v14 = vpop.permute.xlu0 %1250 }
 0x305   : > { %v1253_v45 = vpop.permute.xlu1 %1252  ;;  %v2941_v43 = vpop.permute.xlu0 %1329 }
 0x309   : > { %v2943_v48 = vpop.permute.xlu1 %1327  ;;  %v2945_v13 = vpop.permute.xlu0 %1497 }
 0x30d   : > { %v2947_v15 = vpop.permute.xlu1 %1331  ;;  %v2949_v6 = vpop.permute.xlu0 %1501 }
 0x311   : > { %v2951_v55 = vpop.permute.xlu1 %1499  ;;  %v1579_v22 = vpop.permute.xlu0 %1578 }
 0x315   : > { %v1577_v57 = vpop.permute.xlu1 %1576  ;;  %v2956_v0 = vpop.permute.xlu0 %1750 }
 0x316   : > { %3214 = vst [vmem:[#allocation12_spill] sm:$0xff] %v2956_v0  ;;  %v1582_v37 = vsel %vm771_vm10, %v1577_v57, %v1579_v22  ;;  %v1082_v57 = vrot.slane %v1038_v36, %v2162_v29 }
 0x317   : > { %v2961_v3 = vsel %vm2421_vm1, %v1582_v37, 0.0  ;;  %v1070_v37 = vrot.slane %v1039_v9, %v2146_v24 }
 0x318   : > { %v1646_v38 = vrot.slane %v2961_v3, %v2173_v35 }
 0x319   : > { %v1581_v46 = vpop.permute.xlu1 %1580  ;;  %v1133_v31 = vpop.permute.xlu0 %1132  ;;  %v1072_v26 = vmul.f32 %v1070_v37, %v2733_v30 }
 0x31a   : > { %v1583_v50 = vsel %vm771_vm10, %v1579_v22, %v1581_v46  ;;  %v2976_v53 = vmul.f32 %v1646_v38, %v1641_v47  ;;  %v1071_v22 = vmul.f32 %v1066_v34, %v2733_v30  ;;  %v1058_v38 = vadd.f32 %v1056_v19, %v2780_v4 }
 0x31b   : > { %v2972_v5 = vsel %vm2425_vm2, %v1583_v50, 0.0  ;;  %v1087_v46 = vmul.f32 %v1082_v57, %v2764_v40  ;;  %v1254_v34 = vsel %vm439_vm4, %v1249_v32, %v1251_v14  ;;  %v1102_v4 = vrot.slane %v1039_v9, %v2173_v35 }
 0x31c   : > { %v1650_v59 = vrot.slane %v2972_v5, %v2173_v35  ;;  %v1073_v51 = vadd.f32 %v1071_v22, %v1057_v18  ;;  %v1074_v61 = vadd.f32 %v1072_v26, %v1058_v38  ;;  %v1088_v18 = vmul.f32 %v1086_v8, %v2764_v40 }
 0x31d   : > { %v2980_v11 = vpop.permute.xlu1 %1746  ;;  %v1137_v16 = vpop.permute.xlu0 %1136  ;;  %v1258_v30 = vsel %vm2479_vm5, %v1254_v34, 0.0  ;;  %v1104_v32 = vmul.f32 %v1102_v4, %v2740_v1 }
 0x31e   : > { %v2983_v20 = vmul.f32 %v1650_v59, %v1641_v47  ;;  %v1098_v47 = vrot.slane %v1038_v36, %v2173_v35  ;;  %v1089_v59 = vadd.f32 %v1087_v46, %v1073_v51  ;;  %v1090_v0 = vadd.f32 %v1088_v18, %v1074_v61 }
 0x31f   : > { %v1255_v51 = vsel %vm439_vm4, %v1251_v14, %v1253_v45  ;;  %v1286_v26 = vrot.slane %v1258_v30, %v2146_v24 }
 0x320   : > { %v1103_v52 = vmul.f32 %v1098_v47, %v2740_v1  ;;  %v1333_v1 = vsel %vm519_vm7, %v2943_v48, %v2941_v43 }
 0x321   : > { %v2987_v10 = vpop.permute.xlu1 %1748  ;;  %v1167_v63 = vpop.permute.xlu0 %1166  ;;  %v1337_v48 = vsel %vm2421_vm1, %v1333_v1, 0.0 }
 0x322   : > { %v1105_v57 = vadd.f32 %v1103_v52, %v1089_v59  ;;  %v1106_v52 = vadd.f32 %v1104_v32, %v1090_v0  ;;  %v1302_v59 = vrot.slane %v1258_v30, %v2162_v29  ;;  %v1349_v12 = vrot.slane %v1337_v48, %v2148_v25 }
 0x325   : > { %v1135_v50 = vpop.permute.xlu1 %1134  ;;  %v1171_v41 = vpop.permute.xlu0 %1170 }
 0x326   : > { %v1138_v36 = vsel %vm322_vm3, %v1133_v31, %v1135_v50  ;;  %v1139_v9 = vsel %vm322_vm3, %v1135_v50, %v1137_v16  ;;  %v1270_v31 = vrot.slane %v1258_v30, %v2148_v25 }
 0x327   : > { %v1142_v38 = vadd.f32 %v1138_v36, %v1105_v57  ;;  %v1143_v45 = vadd.f32 %v1139_v9, %v1106_v52  ;;  %v1291_v36 = vmul.f32 %v1286_v26, %v2752_v27  ;;  %v1365_v26 = vrot.slane %v1337_v48, %v2146_v24 }
 0x329   : > { %v1169_v19 = vpop.permute.xlu1 %1168  ;;  %v1201_v22 = vpop.permute.xlu0 %1200 }
 0x32a   : > { %v1172_v37 = vsel %vm322_vm3, %v1167_v63, %v1169_v19  ;;  %v1259_v63 = vsel %vm2483_vm6, %v1255_v51, 0.0  ;;  %v1173_v14 = vsel %vm322_vm3, %v1169_v19, %v1171_v41  ;;  %v1318_v19 = vrot.slane %v1258_v30, %v2173_v35 }
 0x32b   : > { %v1176_v61 = vadd.f32 %v1172_v37, %v1142_v38  ;;  %v1274_v18 = vrot.slane %v1259_v63, %v2148_v25  ;;  %v1177_v4 = vadd.f32 %v1173_v14, %v1143_v45  ;;  %v1290_v57 = vrot.slane %v1259_v63, %v2146_v24 }
 0x32c   : > { %v1334_v37 = vsel %vm519_vm7, %v2941_v43, %v2947_v15  ;;  %v1306_v9 = vrot.slane %v1259_v63, %v2162_v29  ;;  %v1322_v43 = vrot.slane %v1259_v63, %v2173_v35 }
 0x32d   : > { %v1203_v46 = vpop.permute.xlu1 %1202  ;;  %v1205_v40 = vpop.permute.xlu0 %1204  ;;  %v1338_v15 = vsel %vm2425_vm2, %v1334_v37, 0.0  ;;  %v1292_v1 = vmul.f32 %v1290_v57, %v2752_v27 }
 0x32e   : > { %v1206_v47 = vsel %vm322_vm3, %v1201_v22, %v1203_v46  ;;  %v1207_v0 = vsel %vm322_vm3, %v1203_v46, %v1205_v40  ;;  %v1275_v22 = vmul.f32 %v1270_v31, %v2784_v39  ;;  %v1307_v40 = vmul.f32 %v1302_v59, %v2754_v58 }
 0x32f   : > { %v1210_v8 = vadd.f32 %v1206_v47, %v1176_v61  ;;  %v1211_v51 = vadd.f32 %v1207_v0, %v1177_v4  ;;  %v1276_v31 = vmul.f32 %v1274_v18, %v2784_v39  ;;  %v1323_v61 = vmul.f32 %v1318_v19, %v2939_v49 }
 0x330   : > { %v1381_v39 = vrot.slane %v1337_v48, %v2162_v29  ;;  %v1354_v59 = vmul.f32 %v1349_v12, %v2788_v23  ;;  %v1353_v0 = vrot.slane %v1338_v15, %v2148_v25  ;;  %v1324_v56 = vmul.f32 %v1322_v43, %v2939_v49 }
 0x331   : > { %v1237_v16 = vpop.permute.xlu1 %1236  ;;  %v1235_v50 = vpop.permute.xlu0 %1234  ;;  %v1397_v18 = vrot.slane %v1337_v48, %v2173_v35  ;;  %v1370_v4 = vmul.f32 %v1365_v26, %v2774_v33  ;;  %v1369_v27 = vrot.slane %v1338_v15, %v2146_v24  ;;  %v1385_v37 = vrot.slane %v1338_v15, %v2162_v29 }
 0x332   : > { %v1240_v34 = vsel %vm322_vm3, %v1235_v50, %v1237_v16  ;;  %v1308_v50 = vmul.f32 %v1306_v9, %v2754_v58  ;;  %v1355_v57 = vmul.f32 %v1353_v0, %v2788_v23 }
 0x333   : > { %v1244_v41 = vadd.f32 %v1240_v34, %v1210_v8  ;;  %v1402_v49 = vmul.f32 %v1397_v18, %v2778_v2  ;;  %v1371_v48 = vmul.f32 %v1369_v27, %v2774_v33 }
 0x335   : > { %v1277_v32 = vadd.f32 %v1275_v22, %v1244_v41  ;;  %v1422_v38 = vpop.permute.xlu1 %1421  ;;  %v1239_v46 = vpop.permute.xlu0 %1238 }
 0x336   : > { %v1241_v30 = vsel %vm322_vm3, %v1237_v16, %v1239_v46  ;;  %v1401_v46 = vrot.slane %v1338_v15, %v2173_v35 }
 0x337   : > { %v1293_v47 = vadd.f32 %v1291_v36, %v1277_v32  ;;  %v1245_v52 = vadd.f32 %v1241_v30, %v1211_v51  ;;  %v1386_v36 = vmul.f32 %v1381_v39, %v2776_v60 }
 0x338   : > { %v1403_v33 = vmul.f32 %v1401_v46, %v2778_v2 }
 0x339   : > { %v1309_v14 = vadd.f32 %v1307_v40, %v1293_v47  ;;  %v1278_v45 = vadd.f32 %v1276_v31, %v1245_v52  ;;  %v1442_v8 = vpop.permute.xlu1 %1441  ;;  %v1420_v16 = vpop.permute.xlu0 %1419  ;;  %v1387_v52 = vmul.f32 %v1385_v37, %v2776_v60 }
 0x33a   : > { %v1425_v23 = vsel %vm612_vm8, %v1420_v16, %v1422_v38  ;;  %v1504_v16 = vsel %vm691_vm9, %v2951_v55, %v2949_v6 }
 0x33b   : > { %v1325_v63 = vadd.f32 %v1323_v61, %v1309_v14  ;;  %v1294_v34 = vadd.f32 %v1292_v1, %v1278_v45  ;;  %v1503_v61 = vsel %vm691_vm9, %v2945_v13, %v2951_v55 }
 0x33c   : > { %v1507_v45 = vsel %vm2479_vm5, %v1503_v61, 0.0 }
 0x33d   : > { %v1310_v22 = vadd.f32 %v1308_v50, %v1294_v34  ;;  %v1356_v41 = vadd.f32 %v1354_v59, %v1325_v63  ;;  %v1446_v19 = vpop.permute.xlu1 %1445  ;;  %v1424_v58 = vpop.permute.xlu0 %1423  ;;  %v1519_v2 = vrot.slane %v1507_v45, %v2148_v25  ;;  %v1508_v63 = vsel %vm2483_vm6, %v1504_v16, 0.0 }
 0x33e   : > { %v1426_v50 = vsel %vm612_vm8, %v1422_v38, %v1424_v58  ;;  %v1523_v55 = vrot.slane %v1508_v63, %v2148_v25  ;;  %v1551_v27 = vrot.slane %v1507_v45, %v2162_v29  ;;  %v1630_v16 = vrot.slane %v2961_v3, %v2162_v29 }
 0x33f   : > { %v1326_v51 = vadd.f32 %v1324_v56, %v1310_v22  ;;  %v1372_v32 = vadd.f32 %v1370_v4, %v1356_v41  ;;  %v1524_v22 = vmul.f32 %v1519_v2, %v2782_v17 }
 0x341   : > { %v1388_v40 = vadd.f32 %v1386_v36, %v1372_v32  ;;  %v1357_v9 = vadd.f32 %v1355_v57, %v1326_v51  ;;  %v1466_v30 = vpop.permute.xlu1 %1465  ;;  %v1444_v12 = vpop.permute.xlu0 %1443 }
 0x342   : > { %v1447_v60 = vsel %vm612_vm8, %v1442_v8, %v1444_v12  ;;  %v1448_v34 = vsel %vm612_vm8, %v1444_v12, %v1446_v19  ;;  %v1535_v8 = vrot.slane %v1507_v45, %v2146_v24  ;;  %v1539_v19 = vrot.slane %v1508_v63, %v2146_v24 }
 0x343   : > { %v1404_v47 = vadd.f32 %v1402_v49, %v1388_v40  ;;  %v1373_v31 = vadd.f32 %v1371_v48, %v1357_v9  ;;  %v1555_v49 = vrot.slane %v1508_v63, %v2162_v29  ;;  %v1525_v40 = vmul.f32 %v1523_v55, %v2782_v17 }
 0x344   : > { %v1540_v37 = vmul.f32 %v1535_v8, %v2786_v42  ;;  %v1556_v12 = vmul.f32 %v1551_v27, %v2912_v54  ;;  %v1567_v17 = vrot.slane %v1507_v45, %v2173_v35 }
 0x345   : > { %v1429_v43 = vadd.f32 %v1425_v23, %v1404_v47  ;;  %v1389_v26 = vadd.f32 %v1387_v52, %v1373_v31  ;;  %v1488_v14 = vpop.permute.xlu1 %1487  ;;  %v1464_v15 = vpop.permute.xlu0 %1463  ;;  %v1557_v61 = vmul.f32 %v1555_v49, %v2912_v54 }
 0x346   : > { %v1469_v38 = vsel %vm612_vm8, %v1464_v15, %v1466_v30  ;;  %v1571_v15 = vrot.slane %v1508_v63, %v2173_v35 }
 0x347   : > { %v1405_v1 = vadd.f32 %v1403_v33, %v1389_v26  ;;  %v1451_v13 = vadd.f32 %v1447_v60, %v1429_v43  ;;  %v1598_v26 = vrot.slane %v2961_v3, %v2148_v25 }
 0x349   : > { %v1430_v39 = vadd.f32 %v1426_v50, %v1405_v1  ;;  %v1468_v59 = vpop.permute.xlu0 %1467  ;;  %v3068_v0 = vpop.permute.xlu1 %1670  ;;  %v1473_v18 = vadd.f32 %v1469_v38, %v1451_v13  ;;  %v1618_v50 = vrot.slane %v2972_v5, %v2146_v24  ;;  %v1634_v13 = vrot.slane %v2972_v5, %v2162_v29 }
 0x34a   : > { %v1470_v58 = vsel %vm612_vm8, %v1466_v30, %v1468_v59  ;;  %v1541_v30 = vmul.f32 %v1539_v19, %v2786_v42  ;;  %v1614_v42 = vrot.slane %v2961_v3, %v2146_v24  ;;  %v1635_v3 = vmul.f32 %v1630_v16, %v2933_v62  ;;  %v3215_v19 = vld [vmem:[#allocation12_spill] sm:$0xff] }
 0x34b   : > { %v1452_v56 = vadd.f32 %v1448_v34, %v1430_v39  ;;  %v1603_v39 = vmul.f32 %v1598_v26, %v2924_v44  ;;  %v1620_v8 = vmul.f32 %v1618_v50, %v2926_v7  ;;  %v1636_v55 = vmul.f32 %v1634_v13, %v2933_v62 }
 0x34c   : > { %v1619_v38 = vmul.f32 %v1614_v42, %v2926_v7  ;;  %v3217_v42 = vld [vmem:[#allocation7_spill] sm:$0xff] }
 0x34d   : > { %v1486_v4 = vpop.permute.xlu0 %1485  ;;  %v1691_v36 = vpop.permute.xlu1 %1690  ;;  %v1474_v57 = vadd.f32 %v1470_v58, %v1452_v56 }
 0x34e   : > { %v1491_v6 = vsel %vm612_vm8, %v1486_v4, %v1488_v14 }
 0x34f   : > { %v1495_v41 = vadd.f32 %v1491_v6, %v1473_v18 }
 0x351   : > { %v1526_v51 = vadd.f32 %v1524_v22, %v1495_v41  ;;  %v1490_v32 = vpop.permute.xlu0 %1489  ;;  %v1695_v52 = vpop.permute.xlu1 %1694 }
 0x352   : > { %v1492_v48 = vsel %vm612_vm8, %v1488_v14, %v1490_v32  ;;  %v1602_v14 = vrot.slane %v2972_v5, %v2148_v25 }
 0x353   : > { %v1542_v46 = vadd.f32 %v1540_v37, %v1526_v51  ;;  %v1496_v9 = vadd.f32 %v1492_v48, %v1474_v57  ;;  %v1753_v57 = vsel %vm943_vm12, %v2987_v10, %v3215_v19 }
 0x354   : > { %v1604_v45 = vmul.f32 %v1602_v14, %v2924_v44  ;;  %v1752_v44 = vsel %vm943_vm12, %v2980_v11, %v2987_v10  ;;  %v1757_v48 = vsel %vm2483_vm6, %v1753_v57, 0.0 }
 0x355   : > { %v1527_v47 = vadd.f32 %v1525_v40, %v1496_v9  ;;  %v1558_v31 = vadd.f32 %v1556_v12, %v1542_v46  ;;  %v1713_v33 = vpop.permute.xlu1 %1712  ;;  %v1756_v37 = vsel %vm2479_vm5, %v1752_v44, 0.0  ;;  %v1788_v28 = vrot.slane %v1757_v48, %v2146_v24 }
 0x356   : > { %v1768_v21 = vrot.slane %v1756_v37, %v2148_v25  ;;  %v1800_v14 = vrot.slane %v1756_v37, %v2162_v29 }
 0x357   : > { %v1543_v23 = vadd.f32 %v1541_v30, %v1527_v47  ;;  %v1772_v30 = vrot.slane %v1757_v48, %v2148_v25  ;;  %v1784_v47 = vrot.slane %v1756_v37, %v2146_v24  ;;  %v1816_v24 = vrot.slane %v1756_v37, %v2173_v35 }
 0x359   : > { %v1559_v43 = vadd.f32 %v1557_v61, %v1543_v23  ;;  %v1717_v63 = vpop.permute.xlu1 %1716  ;;  %v1789_v50 = vmul.f32 %v1784_v47, %v3217_v42 }
 0x35d   : > { %v1735_v41 = vpop.permute.xlu1 %1734 }
 0x35e   : > { %v1562_v1 = vpop.permute.xlu0 %1561 }
 0x35f   : > { %v1572_v54 = vmul.f32 %v1567_v17, %v1562_v1  ;;  %v1573_v60 = vmul.f32 %v1571_v15, %v1562_v1 }
 0x361   : > { %v1574_v59 = vadd.f32 %v1572_v54, %v1558_v31  ;;  %v1575_v2 = vadd.f32 %v1573_v60, %v1559_v43  ;;  %v1737_v46 = vpop.permute.xlu1 %1736  ;;  %v1804_v54 = vrot.slane %v1757_v48, %v2162_v29 }
 0x362   : > { %v1669_v34 = vpop.permute.xlu0 %1668  ;;  %v1740_v31 = vsel %vm864_vm11, %v1735_v41, %v1737_v46 }
 0x363   : > { %v1605_v56 = vadd.f32 %v1603_v39, %v1574_v59  ;;  %v1606_v18 = vadd.f32 %v1604_v45, %v1575_v2  ;;  %v1674_v62 = vsel %vm864_vm11, %v1669_v34, %v3068_v0  ;;  %v1790_v39 = vmul.f32 %v1788_v28, %v3217_v42 }
 0x365   : > { %v1621_v4 = vadd.f32 %v1619_v38, %v1605_v56  ;;  %v1622_v6 = vadd.f32 %v1620_v8, %v1606_v18  ;;  %v1820_v38 = vrot.slane %v1757_v48, %v2173_v35  ;;  %v2000_v8 = vld [vmem:[%s2066_s21] sm:$0xff] }
 0x366   : > { %v1673_v27 = vpop.permute.xlu0 %1672  ;;  %v1826_v56 = vcombine.high %v2000_v8, %v2000_v8 }
 0x367   : > { %v1637_v5 = vadd.f32 %v1635_v3, %v1621_v4  ;;  %v1638_v22 = vadd.f32 %v1636_v55, %v1622_v6  ;;  %v1675_v11 = vsel %vm864_vm11, %v3068_v0, %v1673_v27 }
 0x369   : > { %v1653_v58 = vadd.f32 %v2976_v53, %v1637_v5  ;;  %v1654_v7 = vadd.f32 %v2983_v20, %v1638_v22 }
 0x36a   : > { %v1693_v51 = vpop.permute.xlu0 %1692 }
 0x36b   : > { %v1678_v32 = vadd.f32 %v1674_v62, %v1653_v58  ;;  %v1679_v49 = vadd.f32 %v1675_v11, %v1654_v7  ;;  %v1696_v53 = vsel %vm864_vm11, %v1691_v36, %v1693_v51  ;;  %v1697_v20 = vsel %vm864_vm11, %v1693_v51, %v1695_v52  ;;  %v3216_v52 = vld [vmem:[#allocation9_spill] sm:$0xff] }
 0x36c   : > { %v1773_v23 = vmul.f32 %v1768_v21, %v3216_v52  ;;  %v1774_v25 = vmul.f32 %v1772_v30, %v3216_v52 }
 0x36d   : > { %v1700_v10 = vadd.f32 %v1696_v53, %v1678_v32  ;;  %v1701_v40 = vadd.f32 %v1697_v20, %v1679_v49 }
 0x36e   : > { %v1715_v9 = vpop.permute.xlu0 %1714  ;;  %v1795_v17 = vpop.permute.xlu1 %1794 }
 0x36f   : > { %v1718_v12 = vsel %vm864_vm11, %v1713_v33, %v1715_v9  ;;  %v1719_v0 = vsel %vm864_vm11, %v1715_v9, %v1717_v63  ;;  %v1805_v60 = vmul.f32 %v1800_v14, %v1795_v17  ;;  %v1806_v2 = vmul.f32 %v1804_v54, %v1795_v17 }
 0x370   : > { %v1722_v36 = vadd.f32 %v1718_v12, %v1700_v10  ;;  %v1723_v61 = vadd.f32 %v1719_v0, %v1701_v40 }
 0x372   : > { %v1744_v43 = vadd.f32 %v1740_v31, %v1722_v36  ;;  %v1739_v26 = vpop.permute.xlu0 %1738 }
 0x373   : > { %v1741_v33 = vsel %vm864_vm11, %v1737_v46, %v1739_v26 }
 0x374   : > { %v1775_v15 = vadd.f32 %v1773_v23, %v1744_v43  ;;  %v1745_v1 = vadd.f32 %v1741_v33, %v1723_v61 }
 0x376   : > { %v1776_v16 = vadd.f32 %v1774_v25, %v1745_v1  ;;  %v1791_v13 = vadd.f32 %v1789_v50, %v1775_v15  ;;  %v1811_v45 = vpop.permute.xlu0 %1810 }
 0x377   : > { %v1821_v59 = vmul.f32 %v1816_v24, %v1811_v45  ;;  %v1822_v4 = vmul.f32 %v1820_v38, %v1811_v45 }
 0x378   : > { %v1792_v63 = vadd.f32 %v1790_v39, %v1776_v16  ;;  %v1807_v34 = vadd.f32 %v1805_v60, %v1791_v13 }
 0x37a   : > { %v1808_v18 = vadd.f32 %v1806_v2, %v1792_v63  ;;  %v1823_v29 = vadd.f32 %v1821_v59, %v1807_v34 }
 0x37c   : > { %v1824_v6 = vadd.f32 %v1822_v4, %v1808_v18  ;;  %v1828_v3 = vadd.f32 %v2000_v8, %v1823_v29 }
 0x37e   : > { %v1829_v55 = vadd.f32 %v1826_v56, %v1824_v6 }
 0x380   : > { %v1832_v27 = vcombine.low %v1828_v3, %v1829_v55 }
 0x382   : > { %1834 = vst [vmem:[%s170_s7] sm:$0xff] %v1832_v27 }
 0x383 PF: > { %s13_s12 = sadd.s32 1, %s2007_s12  }
 0x384   : > { %p10_p4 = scmp.ge.s32.totalorder %s13_s12, 4  }
 0x386   :  { %12 = sbr.rel (!%p10_p4) target bundleno = 1 (0x1), region = 80 }

</bundles_post_ra>
